<compile_context>
chip_gen: v5e
topology: v5e:2x2
jax: 0.10.0
libtpu: 0.0.40
codegen_flags: <defaults>
</compile_context>

<pallas_src>
import functools

import numpy as np
import jax
import jax.numpy as jnp
from jax.experimental import pallas as pl
from jax.experimental.pallas import tpu as pltpu

NEG_SLOPE = 0.01  # nn.LeakyReLU() default negative_slope


def _round_up(x, m):
    return (x + m - 1) // m * m


def _weight_spec(shape, index_map, single_buffer):
    """Tap-weight BlockSpec; single-buffered when its block index never changes."""
    if single_buffer and hasattr(pl, "Buffered"):
        try:
            return pl.BlockSpec(shape, index_map, pipeline_mode=pl.Buffered(1))
        except Exception:  # older JAX without pipeline_mode -> fall back (still correct)
            pass
    return pl.BlockSpec(shape, index_map)


# --------------------------------------------------------------------------- #
# Kernel 1: fused stride-2 3x3 conv (space-to-depth / 4-tap form) + bias + LeakyReLU.
#   f0_ref : (tm,  K0)    bf16  current flat-activation tile
#   f1_ref : (ext, K0)    bf16  first `ext` rows of the NEXT tile (tap lookahead / halo)
#   w_ref  : (4, K0, tn)  bf16  per-tap weight matrices
#   b_ref  : (1, tn)      f32
#   o_ref  : (tm, tn)     bf16
#   cat_ref: (tm+ext, K0) bf16  VMEM scratch holding [f0 ; f1-head]
#   acc_ref: (tm, tn)     f32   VMEM accumulator (MXU-path accumulation, no SSA spill)
# --------------------------------------------------------------------------- #
def _conv_tap_kernel(f0_ref, f1_ref, w_ref, b_ref, o_ref, cat_ref, acc_ref, *, wo):
    tm = f0_ref.shape[0]
    ext = f1_ref.shape[0]

    # Tap 0 (row offset 0) is exactly the current tile: start the MXU immediately, before
    # (and overlapping with) the halo staging below.
    acc_ref[...] = jnp.dot(f0_ref[...], w_ref[0], preferred_element_type=jnp.float32)

    # Stage [f0 ; head-of-next-tile] so the shifted taps are contiguous static slices.
    # TODO(synk): replace with one overlapping (tm+ext)-row pl.Element window to drop this
    # VMEM->VMEM copy (and the lookahead over-fetch) entirely.
    cat_ref[0:tm, :] = f0_ref[...]
    cat_ref[tm:tm + ext, :] = f1_ref[...]

    for t, off in ((1, 1), (2, wo + 1), (3, wo + 2)):        # remaining shifted taps
        acc_ref[...] += jnp.dot(cat_ref[off:off + tm, :], w_ref[t],
                                preferred_element_type=jnp.float32)

    y = acc_ref[...] + b_ref[...]                            # epilogue in f32
    y = jnp.where(y >= 0, y, NEG_SLOPE * y)
    o_ref[...] = y.astype(o_ref.dtype)


def conv3x3_s2_lrelu(x_nhwc, w4, b4, cout, *, tm=None):
    """Conv2d(k=3, s=2, p=1) + LeakyReLU with pre-packed 4-tap weights.

    x: (N,H,W,Cin);  w4: (4, 4*Cin, Cp) bf16;  b4: (1, Cp) f32;  returns (N,H/2,W/2,cout) bf16.
    """
    N, H, W, Cin = x_nhwc.shape
    assert H % 2 == 0 and W % 2 == 0, (H, W)
    Ho, Wo = H // 2, W // 2
    K0 = 4 * Cin
    Cp = w4.shape[-1]
    assert w4.shape == (4, K0, Cp), (w4.shape, K0, Cp)

    # space-to-depth: stride-2 3x3 conv == stride-1 2x2 conv on (N,Ho,Wo,4Cin);
    # channel order is (p, q, ci) for input pixel (2i+p, 2j+q).
    s = x_nhwc.reshape(N, Ho, 2, Wo, 2, Cin).transpose(0, 1, 3, 2, 4, 5)
    s = s.reshape(N, Ho, Wo, K0)
    sp = jnp.pad(s, ((0, 0), (1, 0), (1, 0), (0, 0)))        # pad top/left only
    R0 = N * (Ho + 1) * (Wo + 1)
    F = sp.reshape(R0, K0)                                   # flat rows; taps = row offsets

    if tm is None:                                           # sweepable; 256 when many row tiles
        tm = 256 if R0 >= 512 else 128
    tm = max(tm, pl.next_power_of_2(Wo + 2))                 # widest tap offset must fit a tile
    ext = max(8, pl.next_power_of_2(Wo + 2))                 # lookahead rows (divides tm)
    assert Wo + 2 <= tm and ext <= tm and tm % ext == 0, (Wo, ext, tm)

    Mp = _round_up(R0, tm)
    Rp = Mp + tm                                             # extra zero tile for the lookahead
    F = jnp.pad(F, ((0, Rp - R0), (0, 0))).astype(jnp.bfloat16)

    tn = min(Cp, 256)                                        # >=2 N-programs at Cout=512 (v7x)
    n_tiles, m_tiles = Cp // tn, Mp // tm
    step = tm // ext
    single_w = (n_tiles == 1)                                # weight block index is constant

    kernel = functools.partial(_conv_tap_kernel, wo=Wo)
    flops = 8 * Mp * K0 * Cp
    bytes_accessed = (n_tiles * (Mp // tm) * (tm + ext) * K0      # activation (+halo reread)
                      + 4 * K0 * Cp + Mp * Cp) * 2 + 4 * Cp       # weights once, out, bias

    w_bufs = 1 if single_w else 2
    vmem_est = 2 * ((2 * tm + 2 * ext + tm + ext) * K0 + w_bufs * 4 * K0 * tn + 2 * tm * tn) \
               + 4 * (tm * tn + 2 * tn)
    vmem_limit = int(min(max(2 * vmem_est, 8 << 20), 32 << 20))   # fits v5e..v7x budgets

    out_flat = pl.pallas_call(
        kernel,
        out_shape=jax.ShapeDtypeStruct((Mp, Cp), jnp.bfloat16),
        grid=(n_tiles, m_tiles),                             # rows innermost -> tap weights are
        in_specs=[                                           # DMA'd once per channel tile
            pl.BlockSpec((tm, K0), lambda j, i: (i, 0)),                   # current tile
            pl.BlockSpec((ext, K0), lambda j, i: ((i + 1) * step, 0)),     # halo lookahead
            _weight_spec((4, K0, tn), lambda j, i: (0, 0, j), single_w),   # tap weights
            pl.BlockSpec((1, tn), lambda j, i: (0, j)),                    # bias
        ],
        out_specs=pl.BlockSpec((tm, tn), lambda j, i: (i, j)),
        scratch_shapes=[pltpu.VMEM((tm + ext, K0), jnp.bfloat16),
                        pltpu.VMEM((tm, tn), jnp.float32)],
        compiler_params=pltpu.CompilerParams(
            dimension_semantics=("parallel", "parallel"),
            vmem_limit_bytes=vmem_limit),
        cost_estimate=pl.CostEstimate(
            flops=int(flops), transcendentals=0, bytes_accessed=int(bytes_accessed)),
    )(F, F, w4, b4)

    # drop garbage rows (padded spatial positions) and padded channels
    out = out_flat[:R0].reshape(N, Ho + 1, Wo + 1, Cp)[:, :Ho, :Wo, :cout]
    return out


# --------------------------------------------------------------------------- #
# Kernel 2: fused tail = conv(4x4->2x2) + LeakyReLU + conv(2x2->1x1) + LeakyReLU + EqualLinear.
# x_ref holds one 9-tap im2col row-block per output pixel `a` of the first conv; the second
# conv collapses to sum_a h_a @ w2[a].  All intermediates stay in VMEM; one launch total.
# --------------------------------------------------------------------------- #
def _tail_kernel(x_ref, w1_ref, b1_ref, w2_ref, b2_ref, wl_ref, bl_ref, o_ref):
    h2 = None
    for a in range(4):
        h = jnp.dot(x_ref[a], w1_ref[...], preferred_element_type=jnp.float32) + b1_ref[...]
        h = jnp.where(h >= 0, h, NEG_SLOPE * h).astype(jnp.bfloat16)
        c = jnp.dot(h, w2_ref[a], preferred_element_type=jnp.float32)
        h2 = c if h2 is None else h2 + c
    h2 = h2 + b2_ref[...]
    h2 = jnp.where(h2 >= 0, h2, NEG_SLOPE * h2).astype(jnp.bfloat16)
    o_ref[...] = jnp.dot(h2, wl_ref[...], preferred_element_type=jnp.float32) + bl_ref[...]


def tail_fused(x4_nhwc, tp):
    """Fused last-two convs + EqualLinear.  x4: (N, 4, 4, C) -> (N, out_dim)."""
    N, H, W, C = x4_nhwc.shape
    assert H == 4 and W == 4 and C == tp["C"], (x4_nhwc.shape, tp["C"])
    K1, K1p = tp["K1"], tp["w1"].shape[0]
    Op = tp["wl"].shape[1]
    Np = _round_up(N, 8)

    xp = jnp.pad(x4_nhwc, ((0, 0), (1, 1), (1, 1), (0, 0)))               # (N, 6, 6, C)
    cols = [xp[:, 2 * i:2 * i + 3, 2 * j:2 * j + 3, :].reshape(N, K1)     # 9-tap im2col per
            for i in (0, 1) for j in (0, 1)]                              # output pixel a=2i+j
    x_t = jnp.stack(cols, 0)                                              # (4, N, 9C)
    x_t = jnp.pad(x_t, ((0, 0), (0, Np - N), (0, K1p - K1))).astype(jnp.bfloat16)

    out = pl.pallas_call(
        _tail_kernel,
        out_shape=jax.ShapeDtypeStruct((Np, Op), jnp.float32),
        in_specs=[pl.BlockSpec(memory_space=pltpu.MemorySpace.VMEM)] * 7,
        out_specs=pl.BlockSpec(memory_space=pltpu.MemorySpace.VMEM),
    )(x_t, tp["w1"], tp["b1"], tp["w2"], tp["b2"], tp["wl"], tp["bl"])
    return out[:N, :tp["out_dim"]]


# ------------------------ one-time weight preprocessing --------------------- #
def _pack_conv_taps(w_hwio, b, cp):
    """(3,3,Cin,Cout) -> (4 taps, 4*Cin, Cp) bf16 with (p,q,ci) contraction order + bias."""
    cin, cout = w_hwio.shape[2], w_hwio.shape[3]
    wp = jnp.pad(w_hwio.astype(jnp.float32), ((1, 0), (1, 0), (0, 0), (0, 0)))  # (4,4,ci,co)
    w4 = wp.reshape(2, 2, 2, 2, cin, cout).transpose(0, 2, 1, 3, 4, 5)          # (di,dj,p,q,..)
    w4 = w4.reshape(4, 4 * cin, cout)
    w4 = jnp.pad(w4, ((0, 0), (0, 0), (0, cp - cout))).astype(jnp.bfloat16)
    b4 = jnp.pad(b.astype(jnp.float32), (0, cp - cout)).reshape(1, cp)
    return w4, b4


def _pack_tail(conv_a, conv_b, w_lin, b_lin, lr_mul=1.0):
    (wa, ba), (wb, bb) = conv_a, conv_b
    C, C1 = wa.shape[2], wa.shape[3]
    C2 = wb.shape[3]
    out_dim, in_dim = w_lin.shape
    assert wb.shape[2] == C1 and in_dim == C2
    K1 = 9 * C
    K1p, C1p = _round_up(K1, 128), _round_up(C1, 128)
    C2p, Op = _round_up(C2, 128), _round_up(out_dim, 128)

    w1 = wa.astype(jnp.float32).reshape(K1, C1)                       # (ky,kx,ci) rows
    w1 = jnp.pad(w1, ((0, K1p - K1), (0, C1p - C1))).astype(jnp.bfloat16)
    b1 = jnp.pad(ba.astype(jnp.float32), (0, C1p - C1)).reshape(1, C1p)

    w2 = wb.astype(jnp.float32)[1:3, 1:3].reshape(4, C1, C2)          # only taps {1,2}^2 hit
    w2 = jnp.pad(w2, ((0, 0), (0, C1p - C1), (0, C2p - C2))).astype(jnp.bfloat16)
    b2 = jnp.pad(bb.astype(jnp.float32), (0, C2p - C2)).reshape(1, C2p)

    scale = (1.0 / np.sqrt(in_dim)) * lr_mul                          # EqualLinear scaling
    wl = (w_lin.astype(jnp.float32) * scale).T                        # (in, out)
    wl = jnp.pad(wl, ((0, C2p - C2), (0, Op - out_dim))).astype(jnp.bfloat16)
    bl = jnp.pad((b_lin * lr_mul).astype(jnp.float32), (0, Op - out_dim)).reshape(1, Op)
    return dict(w1=w1, b1=b1, w2=w2, b2=b2, wl=wl, bl=bl, C=C, K1=K1, out_dim=out_dim)


def prepare_params(params):
    """One-time weight repack/pad/cast (keep OUT of the jitted per-step forward)."""
    convs = params["convs"]
    assert len(convs) >= 2, "GradualStyleBlock needs spatial >= 4 (num_pools >= 2)"
    packed_convs = []
    for (w, b) in convs[:-2]:                                # layers down to spatial 4
        cout = w.shape[-1]
        cp = _round_up(cout, 128)
        w4, b4 = _pack_conv_taps(w, b, cp)
        packed_convs.append((w4, b4, cout))
    tail = _pack_tail(convs[-2], convs[-1], params["linear_w"], params["linear_b"])
    return {"convs": packed_convs, "tail": tail}


# ------------------------------- GradualStyleBlock -------------------------- #
def init_params(key, in_c, out_c, spatial):
    num_pools = int(np.log2(spatial))
    params = {"convs": []}
    c_in = in_c
    for _ in range(num_pools):
        key, k_w, k_b = jax.random.split(key, 3)
        w = jax.random.normal(k_w, (3, 3, c_in, out_c), jnp.float32) * 0.1
        b = jax.random.normal(k_b, (out_c,), jnp.float32) * 0.1
        params["convs"].append((w, b))
        c_in = out_c
    key, k_w = jax.random.split(key)
    params["linear_w"] = jax.random.normal(k_w, (out_c, out_c), jnp.float32)  # (out, in)
    params["linear_b"] = jnp.zeros((out_c,), jnp.float32)
    return params


def gradual_style_block(packed, x_nchw):
    x = jnp.transpose(x_nchw, (0, 2, 3, 1))                  # NCHW -> NHWC (once)
    for (w4, b4, cout) in packed["convs"]:                   # all convs down to 4x4
        x = conv3x3_s2_lrelu(x, w4, b4, cout)
    return tail_fused(x, packed["tail"])                     # 4->2, 2->1 convs + linear fused


# ----------------------- pure-JAX reference (same bf16 contract) ------------ #
def reference(params, x_nchw):
    x = jnp.transpose(x_nchw, (0, 2, 3, 1)).astype(jnp.float32)
    for (w, b) in params["convs"]:
        y = jax.lax.conv_general_dilated(
            x.astype(jnp.bfloat16), w.astype(jnp.bfloat16),
            window_strides=(2, 2), padding=((1, 1), (1, 1)),
            dimension_numbers=("NHWC", "HWIO", "NHWC"),
            preferred_element_type=jnp.float32)
        y = y + b
        x = jnp.where(y >= 0, y, NEG_SLOPE * y)
    out_c = params["convs"][-1][0].shape[-1]
    x = x.reshape(-1, out_c)
    w_lin, b_lin = params["linear_w"], params["linear_b"]
    w_eff = (w_lin * (1.0 / np.sqrt(w_lin.shape[1]))).T
    y = jnp.dot(x.astype(jnp.bfloat16), w_eff.astype(jnp.bfloat16),
                preferred_element_type=jnp.float32)
    return y + b_lin


if __name__ == "__main__":
    batch, in_c, out_c, spatial = 2, 4, 32, 16   # num_pools = log2(16) = 4 conv layers

    key = jax.random.PRNGKey(0)
    key, k_x = jax.random.split(key)
    x = jax.random.normal(k_x, (batch, in_c, spatial, spatial), jnp.float32)  # NCHW like torch
    params = init_params(key, in_c, out_c, spatial)

    packed = prepare_params(params)              # one-time repack, outside the jitted forward
    fwd = jax.jit(functools.partial(gradual_style_block, packed))

    out = jax.block_until_ready(fwd(x))
    assert out.shape == (batch, out_c), out.shape

    ref = jax.block_until_ready(reference(params, x))
    np.testing.assert_allclose(np.asarray(out), np.asarray(ref), rtol=2e-2, atol=2e-2)

    print("KERNEL_OK")
</pallas_src>

<mosaic_0001>
module attributes {stable_mosaic.version = 11 : i64} {
  func.func @_conv_tap_kernel(%arg0: i32, %arg1: i32, %arg2: memref<128x16xbf16, #tpu.memory_space<vmem>>, %arg3: memref<16x16xbf16, #tpu.memory_space<vmem>>, %arg4: memref<4x16x128xbf16, #tpu.memory_space<vmem>>, %arg5: memref<1x128xf32, #tpu.memory_space<vmem>>, %arg6: memref<128x128xbf16, #tpu.memory_space<vmem>>, %arg7: memref<144x16xbf16, #tpu.memory_space<vmem>>, %arg8: memref<128x128xf32, #tpu.memory_space<vmem>>) attributes {dimension_semantics = [#tpu.dimension_semantics<parallel>, #tpu.dimension_semantics<parallel>], iteration_bounds = array<i64: 1, 2>, scalar_prefetch = 0 : i64, scratch_operands = 2 : i64, tpu.core_type = #tpu.core_type<tc>, window_params = [{transform_indices = @transform_0, window_bounds = array<i64: 128, 16>}, {transform_indices = @transform_1, window_bounds = array<i64: 16, 16>}, {pipeline_mode = #tpu.pipeline_mode<synchronous>, transform_indices = @transform_2, window_bounds = array<i64: 4, 16, 128>}, {transform_indices = @transform_3, window_bounds = array<i64: 1, 128>}, {transform_indices = @transform_4, window_bounds = array<i64: 128, 128>}]} {
    %c0 = arith.constant 0 : index
    %c0_0 = arith.constant 0 : index
    %0 = vector.load %arg2[%c0, %c0_0] : memref<128x16xbf16, #tpu.memory_space<vmem>>, vector<128x16xbf16>
    %c0_1 = arith.constant 0 : index
    %c0_2 = arith.constant 0 : index
    %c0_3 = arith.constant 0 : index
    %1 = vector.load %arg4[%c0_1, %c0_2, %c0_3] : memref<4x16x128xbf16, #tpu.memory_space<vmem>>, vector<1x16x128xbf16>
    %2 = vector.shape_cast %1 : vector<1x16x128xbf16> to vector<16x128xbf16>
    %cst = arith.constant dense<0.000000e+00> : vector<128x128xf32>
    %3 = tpu.matmul %0, %2, %cst {dimension_numbers = #tpu.dot_dimension_numbers<[1], [0], [0], [1], [0, 0, 1, 1], [], []>} : vector<128x16xbf16>, vector<16x128xbf16>, vector<128x128xf32> -> vector<128x128xf32>
    %c0_4 = arith.constant 0 : index
    %c0_5 = arith.constant 0 : index
    %4 = vector.load %arg8[%c0_4, %c0_5] : memref<128x128xf32, #tpu.memory_space<vmem>>, vector<128x128xf32>
    tpu.vector_store %arg8[%c0_4, %c0_5], %3 {strides = array<i32>} : memref<128x128xf32, #tpu.memory_space<vmem>>, vector<128x128xf32>,
    %c0_6 = arith.constant 0 : index
    %c0_7 = arith.constant 0 : index
    %5 = vector.load %arg2[%c0_6, %c0_7] : memref<128x16xbf16, #tpu.memory_space<vmem>>, vector<128x16xbf16>
    %c0_8 = arith.constant 0 : index
    %c0_9 = arith.constant 0 : index
    %6 = vector.load %arg7[%c0_8, %c0_9] : memref<144x16xbf16, #tpu.memory_space<vmem>>, vector<128x16xbf16>
    tpu.vector_store %arg7[%c0_8, %c0_9], %5 {strides = array<i32>} : memref<144x16xbf16, #tpu.memory_space<vmem>>, vector<128x16xbf16>,
    %c0_10 = arith.constant 0 : index
    %c0_11 = arith.constant 0 : index
    %7 = vector.load %arg3[%c0_10, %c0_11] : memref<16x16xbf16, #tpu.memory_space<vmem>>, vector<16x16xbf16>
    %c128 = arith.constant 128 : index
    %c0_12 = arith.constant 0 : index
    %8 = vector.load %arg7[%c128, %c0_12] : memref<144x16xbf16, #tpu.memory_space<vmem>>, vector<16x16xbf16>
    tpu.vector_store %arg7[%c128, %c0_12], %7 {strides = array<i32>} : memref<144x16xbf16, #tpu.memory_space<vmem>>, vector<16x16xbf16>,
    %c0_13 = arith.constant 0 : index
    %c0_14 = arith.constant 0 : index
    %9 = vector.load %arg8[%c0_13, %c0_14] : memref<128x128xf32, #tpu.memory_space<vmem>>, vector<128x128xf32>
    %c1 = arith.constant 1 : index
    %c0_15 = arith.constant 0 : index
    %10 = vector.load %arg7[%c1, %c0_15] : memref<144x16xbf16, #tpu.memory_space<vmem>>, vector<128x16xbf16>
    %c1_16 = arith.constant 1 : index
    %c0_17 = arith.constant 0 : index
    %c0_18 = arith.constant 0 : index
    %11 = vector.load %arg4[%c1_16, %c0_17, %c0_18] : memref<4x16x128xbf16, #tpu.memory_space<vmem>>, vector<1x16x128xbf16>
    %12 = vector.shape_cast %11 : vector<1x16x128xbf16> to vector<16x128xbf16>
    %cst_19 = arith.constant dense<0.000000e+00> : vector<128x128xf32>
    %13 = tpu.matmul %10, %12, %cst_19 {dimension_numbers = #tpu.dot_dimension_numbers<[1], [0], [0], [1], [0, 0, 1, 1], [], []>} : vector<128x16xbf16>, vector<16x128xbf16>, vector<128x128xf32> -> vector<128x128xf32>
    %14 = arith.addf %9, %13 : vector<128x128xf32>
    %c0_20 = arith.constant 0 : index
    %c0_21 = arith.constant 0 : index
    %15 = vector.load %arg8[%c0_20, %c0_21] : memref<128x128xf32, #tpu.memory_space<vmem>>, vector<128x128xf32>
    tpu.vector_store %arg8[%c0_20, %c0_21], %14 {strides = array<i32>} : memref<128x128xf32, #tpu.memory_space<vmem>>, vector<128x128xf32>,
    %c0_22 = arith.constant 0 : index
    %c0_23 = arith.constant 0 : index
    %16 = vector.load %arg8[%c0_22, %c0_23] : memref<128x128xf32, #tpu.memory_space<vmem>>, vector<128x128xf32>
    %c9 = arith.constant 9 : index
    %c0_24 = arith.constant 0 : index
    %17 = vector.load %arg7[%c9, %c0_24] : memref<144x16xbf16, #tpu.memory_space<vmem>>, vector<128x16xbf16>
    %c2 = arith.constant 2 : index
    %c0_25 = arith.constant 0 : index
    %c0_26 = arith.constant 0 : index
    %18 = vector.load %arg4[%c2, %c0_25, %c0_26] : memref<4x16x128xbf16, #tpu.memory_space<vmem>>, vector<1x16x128xbf16>
    %19 = vector.shape_cast %18 : vector<1x16x128xbf16> to vector<16x128xbf16>
    %cst_27 = arith.constant dense<0.000000e+00> : vector<128x128xf32>
    %20 = tpu.matmul %17, %19, %cst_27 {dimension_numbers = #tpu.dot_dimension_numbers<[1], [0], [0], [1], [0, 0, 1, 1], [], []>} : vector<128x16xbf16>, vector<16x128xbf16>, vector<128x128xf32> -> vector<128x128xf32>
    %21 = arith.addf %16, %20 : vector<128x128xf32>
    %c0_28 = arith.constant 0 : index
    %c0_29 = arith.constant 0 : index
    %22 = vector.load %arg8[%c0_28, %c0_29] : memref<128x128xf32, #tpu.memory_space<vmem>>, vector<128x128xf32>
    tpu.vector_store %arg8[%c0_28, %c0_29], %21 {strides = array<i32>} : memref<128x128xf32, #tpu.memory_space<vmem>>, vector<128x128xf32>,
    %c0_30 = arith.constant 0 : index
    %c0_31 = arith.constant 0 : index
    %23 = vector.load %arg8[%c0_30, %c0_31] : memref<128x128xf32, #tpu.memory_space<vmem>>, vector<128x128xf32>
    %c10 = arith.constant 10 : index
    %c0_32 = arith.constant 0 : index
    %24 = vector.load %arg7[%c10, %c0_32] : memref<144x16xbf16, #tpu.memory_space<vmem>>, vector<128x16xbf16>
    %c3 = arith.constant 3 : index
    %c0_33 = arith.constant 0 : index
    %c0_34 = arith.constant 0 : index
    %25 = vector.load %arg4[%c3, %c0_33, %c0_34] : memref<4x16x128xbf16, #tpu.memory_space<vmem>>, vector<1x16x128xbf16>
    %26 = vector.shape_cast %25 : vector<1x16x128xbf16> to vector<16x128xbf16>
    %cst_35 = arith.constant dense<0.000000e+00> : vector<128x128xf32>
    %27 = tpu.matmul %24, %26, %cst_35 {dimension_numbers = #tpu.dot_dimension_numbers<[1], [0], [0], [1], [0, 0, 1, 1], [], []>} : vector<128x16xbf16>, vector<16x128xbf16>, vector<128x128xf32> -> vector<128x128xf32>
    %28 = arith.addf %23, %27 : vector<128x128xf32>
    %c0_36 = arith.constant 0 : index
    %c0_37 = arith.constant 0 : index
    %29 = vector.load %arg8[%c0_36, %c0_37] : memref<128x128xf32, #tpu.memory_space<vmem>>, vector<128x128xf32>
    tpu.vector_store %arg8[%c0_36, %c0_37], %28 {strides = array<i32>} : memref<128x128xf32, #tpu.memory_space<vmem>>, vector<128x128xf32>,
    %c0_38 = arith.constant 0 : index
    %c0_39 = arith.constant 0 : index
    %30 = vector.load %arg8[%c0_38, %c0_39] : memref<128x128xf32, #tpu.memory_space<vmem>>, vector<128x128xf32>
    %c0_40 = arith.constant 0 : index
    %c0_41 = arith.constant 0 : index
    %31 = vector.load %arg5[%c0_40, %c0_41] : memref<1x128xf32, #tpu.memory_space<vmem>>, vector<1x128xf32>
    %32 = vector.broadcast %31 : vector<1x128xf32> to vector<128x128xf32>
    %33 = arith.addf %30, %32 : vector<128x128xf32>
    %cst_42 = arith.constant 0.000000e+00 : f32
    %34 = vector.broadcast %cst_42 : f32 to vector<128x128xf32>
    %35 = arith.cmpf oge, %33, %34 : vector<128x128xf32>
    %cst_43 = arith.constant 0.00999999977 : f32
    %36 = vector.broadcast %cst_43 : f32 to vector<128x128xf32>
    %37 = arith.mulf %36, %33 : vector<128x128xf32>
    %38 = arith.select %35, %33, %37 : vector<128x128xi1>, vector<128x128xf32>
    %39 = arith.truncf %38 : vector<128x128xf32> to vector<128x128xbf16>
    %c0_44 = arith.constant 0 : index
    %c0_45 = arith.constant 0 : index
    %40 = vector.load %arg6[%c0_44, %c0_45] : memref<128x128xbf16, #tpu.memory_space<vmem>>, vector<128x128xbf16>
    tpu.vector_store %arg6[%c0_44, %c0_45], %39 {strides = array<i32>} : memref<128x128xbf16, #tpu.memory_space<vmem>>, vector<128x128xbf16>,
    return
  }
  func.func @transform_0(%arg0: i32, %arg1: i32) -> (i32, i32) {
    %c0_i32 = arith.constant 0 : i32
    %c0_i32_0 = arith.constant 0 : i32
    return %arg1, %c0_i32 : i32, i32
  }
  func.func @transform_1(%arg0: i32, %arg1: i32) -> (i32, i32) {
    %c1_i32 = arith.constant 1 : i32
    %0 = arith.addi %arg1, %c1_i32 : i32
    %c8_i32 = arith.constant 8 : i32
    %1 = arith.muli %0, %c8_i32 : i32
    %c0_i32 = arith.constant 0 : i32
    %c0_i32_0 = arith.constant 0 : i32
    return %1, %c0_i32 : i32, i32
  }
  func.func @transform_2(%arg0: i32, %arg1: i32) -> (i32, i32, i32) {
    %c0_i32 = arith.constant 0 : i32
    %c0_i32_0 = arith.constant 0 : i32
    %c0_i32_1 = arith.constant 0 : i32
    return %c0_i32, %c0_i32_0, %arg0 : i32, i32, i32
  }
  func.func @transform_3(%arg0: i32, %arg1: i32) -> (i32, i32) {
    %c0_i32 = arith.constant 0 : i32
    %c0_i32_0 = arith.constant 0 : i32
    return %c0_i32, %arg0 : i32, i32
  }
  func.func @transform_4(%arg0: i32, %arg1: i32) -> (i32, i32) {
    %c0_i32 = arith.constant 0 : i32
    return %arg1, %arg0 : i32, i32
  }
}

module attributes {stable_mosaic.version = 11 : i64} {
  func.func @_conv_tap_kernel(%arg0: i32, %arg1: i32, %arg2: memref<128x128xbf16, #tpu.memory_space<vmem>>, %arg3: memref<8x128xbf16, #tpu.memory_space<vmem>>, %arg4: memref<4x128x128xbf16, #tpu.memory_space<vmem>>, %arg5: memref<1x128xf32, #tpu.memory_space<vmem>>, %arg6: memref<128x128xbf16, #tpu.memory_space<vmem>>, %arg7: memref<136x128xbf16, #tpu.memory_space<vmem>>, %arg8: memref<128x128xf32, #tpu.memory_space<vmem>>) attributes {dimension_semantics = [#tpu.dimension_semantics<parallel>, #tpu.dimension_semantics<parallel>], iteration_bounds = array<i64: 1, 1>, scalar_prefetch = 0 : i64, scratch_operands = 2 : i64, tpu.core_type = #tpu.core_type<tc>, window_params = [{transform_indices = @transform_0, window_bounds = array<i64: 128, 128>}, {transform_indices = @transform_1, window_bounds = array<i64: 8, 128>}, {pipeline_mode = #tpu.pipeline_mode<synchronous>, transform_indices = @transform_2, window_bounds = array<i64: 4, 128, 128>}, {transform_indices = @transform_3, window_bounds = array<i64: 1, 128>}, {transform_indices = @transform_4, window_bounds = array<i64: 128, 128>}]} {
    %c0 = arith.constant 0 : index
    %c0_0 = arith.constant 0 : index
    %0 = vector.load %arg2[%c0, %c0_0] : memref<128x128xbf16, #tpu.memory_space<vmem>>, vector<128x128xbf16>
    %c0_1 = arith.constant 0 : index
    %c0_2 = arith.constant 0 : index
    %c0_3 = arith.constant 0 : index
    %1 = vector.load %arg4[%c0_1, %c0_2, %c0_3] : memref<4x128x128xbf16, #tpu.memory_space<vmem>>, vector<1x128x128xbf16>
    %2 = vector.shape_cast %1 : vector<1x128x128xbf16> to vector<128x128xbf16>
    %cst = arith.constant dense<0.000000e+00> : vector<128x128xf32>
    %3 = tpu.matmul %0, %2, %cst {dimension_numbers = #tpu.dot_dimension_numbers<[1], [0], [0], [1], [0, 0, 1, 1], [], []>} : vector<128x128xbf16>, vector<128x128xbf16>, vector<128x128xf32> -> vector<128x128xf32>
    %c0_4 = arith.constant 0 : index
    %c0_5 = arith.constant 0 : index
    %4 = vector.load %arg8[%c0_4, %c0_5] : memref<128x128xf32, #tpu.memory_space<vmem>>, vector<128x128xf32>
    tpu.vector_store %arg8[%c0_4, %c0_5], %3 {strides = array<i32>} : memref<128x128xf32, #tpu.memory_space<vmem>>, vector<128x128xf32>,
    %c0_6 = arith.constant 0 : index
    %c0_7 = arith.constant 0 : index
    %5 = vector.load %arg2[%c0_6, %c0_7] : memref<128x128xbf16, #tpu.memory_space<vmem>>, vector<128x128xbf16>
    %c0_8 = arith.constant 0 : index
    %c0_9 = arith.constant 0 : index
    %6 = vector.load %arg7[%c0_8, %c0_9] : memref<136x128xbf16, #tpu.memory_space<vmem>>, vector<128x128xbf16>
    tpu.vector_store %arg7[%c0_8, %c0_9], %5 {strides = array<i32>} : memref<136x128xbf16, #tpu.memory_space<vmem>>, vector<128x128xbf16>,
    %c0_10 = arith.constant 0 : index
    %c0_11 = arith.constant 0 : index
    %7 = vector.load %arg3[%c0_10, %c0_11] : memref<8x128xbf16, #tpu.memory_space<vmem>>, vector<8x128xbf16>
    %c128 = arith.constant 128 : index
    %c0_12 = arith.constant 0 : index
    %8 = vector.load %arg7[%c128, %c0_12] : memref<136x128xbf16, #tpu.memory_space<vmem>>, vector<8x128xbf16>
    tpu.vector_store %arg7[%c128, %c0_12], %7 {strides = array<i32>} : memref<136x128xbf16, #tpu.memory_space<vmem>>, vector<8x128xbf16>,
    %c0_13 = arith.constant 0 : index
    %c0_14 = arith.constant 0 : index
    %9 = vector.load %arg8[%c0_13, %c0_14] : memref<128x128xf32, #tpu.memory_space<vmem>>, vector<128x128xf32>
    %c1 = arith.constant 1 : index
    %c0_15 = arith.constant 0 : index
    %10 = vector.load %arg7[%c1, %c0_15] : memref<136x128xbf16, #tpu.memory_space<vmem>>, vector<128x128xbf16>
    %c1_16 = arith.constant 1 : index
    %c0_17 = arith.constant 0 : index
    %c0_18 = arith.constant 0 : index
    %11 = vector.load %arg4[%c1_16, %c0_17, %c0_18] : memref<4x128x128xbf16, #tpu.memory_space<vmem>>, vector<1x128x128xbf16>
    %12 = vector.shape_cast %11 : vector<1x128x128xbf16> to vector<128x128xbf16>
    %cst_19 = arith.constant dense<0.000000e+00> : vector<128x128xf32>
    %13 = tpu.matmul %10, %12, %cst_19 {dimension_numbers = #tpu.dot_dimension_numbers<[1], [0], [0], [1], [0, 0, 1, 1], [], []>} : vector<128x128xbf16>, vector<128x128xbf16>, vector<128x128xf32> -> vector<128x128xf32>
    %14 = arith.addf %9, %13 : vector<128x128xf32>
    %c0_20 = arith.constant 0 : index
    %c0_21 = arith.constant 0 : index
    %15 = vector.load %arg8[%c0_20, %c0_21] : memref<128x128xf32, #tpu.memory_space<vmem>>, vector<128x128xf32>
    tpu.vector_store %arg8[%c0_20, %c0_21], %14 {strides = array<i32>} : memref<128x128xf32, #tpu.memory_space<vmem>>, vector<128x128xf32>,
    %c0_22 = arith.constant 0 : index
    %c0_23 = arith.constant 0 : index
    %16 = vector.load %arg8[%c0_22, %c0_23] : memref<128x128xf32, #tpu.memory_space<vmem>>, vector<128x128xf32>
    %c5 = arith.constant 5 : index
    %c0_24 = arith.constant 0 : index
    %17 = vector.load %arg7[%c5, %c0_24] : memref<136x128xbf16, #tpu.memory_space<vmem>>, vector<128x128xbf16>
    %c2 = arith.constant 2 : index
    %c0_25 = arith.constant 0 : index
    %c0_26 = arith.constant 0 : index
    %18 = vector.load %arg4[%c2, %c0_25, %c0_26] : memref<4x128x128xbf16, #tpu.memory_space<vmem>>, vector<1x128x128xbf16>
    %19 = vector.shape_cast %18 : vector<1x128x128xbf16> to vector<128x128xbf16>
    %cst_27 = arith.constant dense<0.000000e+00> : vector<128x128xf32>
    %20 = tpu.matmul %17, %19, %cst_27 {dimension_numbers = #tpu.dot_dimension_numbers<[1], [0], [0], [1], [0, 0, 1, 1], [], []>} : vector<128x128xbf16>, vector<128x128xbf16>, vector<128x128xf32> -> vector<128x128xf32>
    %21 = arith.addf %16, %20 : vector<128x128xf32>
    %c0_28 = arith.constant 0 : index
    %c0_29 = arith.constant 0 : index
    %22 = vector.load %arg8[%c0_28, %c0_29] : memref<128x128xf32, #tpu.memory_space<vmem>>, vector<128x128xf32>
    tpu.vector_store %arg8[%c0_28, %c0_29], %21 {strides = array<i32>} : memref<128x128xf32, #tpu.memory_space<vmem>>, vector<128x128xf32>,
    %c0_30 = arith.constant 0 : index
    %c0_31 = arith.constant 0 : index
    %23 = vector.load %arg8[%c0_30, %c0_31] : memref<128x128xf32, #tpu.memory_space<vmem>>, vector<128x128xf32>
    %c6 = arith.constant 6 : index
    %c0_32 = arith.constant 0 : index
    %24 = vector.load %arg7[%c6, %c0_32] : memref<136x128xbf16, #tpu.memory_space<vmem>>, vector<128x128xbf16>
    %c3 = arith.constant 3 : index
    %c0_33 = arith.constant 0 : index
    %c0_34 = arith.constant 0 : index
    %25 = vector.load %arg4[%c3, %c0_33, %c0_34] : memref<4x128x128xbf16, #tpu.memory_space<vmem>>, vector<1x128x128xbf16>
    %26 = vector.shape_cast %25 : vector<1x128x128xbf16> to vector<128x128xbf16>
    %cst_35 = arith.constant dense<0.000000e+00> : vector<128x128xf32>
    %27 = tpu.matmul %24, %26, %cst_35 {dimension_numbers = #tpu.dot_dimension_numbers<[1], [0], [0], [1], [0, 0, 1, 1], [], []>} : vector<128x128xbf16>, vector<128x128xbf16>, vector<128x128xf32> -> vector<128x128xf32>
    %28 = arith.addf %23, %27 : vector<128x128xf32>
    %c0_36 = arith.constant 0 : index
    %c0_37 = arith.constant 0 : index
    %29 = vector.load %arg8[%c0_36, %c0_37] : memref<128x128xf32, #tpu.memory_space<vmem>>, vector<128x128xf32>
    tpu.vector_store %arg8[%c0_36, %c0_37], %28 {strides = array<i32>} : memref<128x128xf32, #tpu.memory_space<vmem>>, vector<128x128xf32>,
    %c0_38 = arith.constant 0 : index
    %c0_39 = arith.constant 0 : index
    %30 = vector.load %arg8[%c0_38, %c0_39] : memref<128x128xf32, #tpu.memory_space<vmem>>, vector<128x128xf32>
    %c0_40 = arith.constant 0 : index
    %c0_41 = arith.constant 0 : index
    %31 = vector.load %arg5[%c0_40, %c0_41] : memref<1x128xf32, #tpu.memory_space<vmem>>, vector<1x128xf32>
    %32 = vector.broadcast %31 : vector<1x128xf32> to vector<128x128xf32>
    %33 = arith.addf %30, %32 : vector<128x128xf32>
    %cst_42 = arith.constant 0.000000e+00 : f32
    %34 = vector.broadcast %cst_42 : f32 to vector<128x128xf32>
    %35 = arith.cmpf oge, %33, %34 : vector<128x128xf32>
    %cst_43 = arith.constant 0.00999999977 : f32
    %36 = vector.broadcast %cst_43 : f32 to vector<128x128xf32>
    %37 = arith.mulf %36, %33 : vector<128x128xf32>
    %38 = arith.select %35, %33, %37 : vector<128x128xi1>, vector<128x128xf32>
    %39 = arith.truncf %38 : vector<128x128xf32> to vector<128x128xbf16>
    %c0_44 = arith.constant 0 : index
    %c0_45 = arith.constant 0 : index
    %40 = vector.load %arg6[%c0_44, %c0_45] : memref<128x128xbf16, #tpu.memory_space<vmem>>, vector<128x128xbf16>
    tpu.vector_store %arg6[%c0_44, %c0_45], %39 {strides = array<i32>} : memref<128x128xbf16, #tpu.memory_space<vmem>>, vector<128x128xbf16>,
    return
  }
  func.func @transform_0(%arg0: i32, %arg1: i32) -> (i32, i32) {
    %c0_i32 = arith.constant 0 : i32
    %c0_i32_0 = arith.constant 0 : i32
    return %arg1, %c0_i32 : i32, i32
  }
  func.func @transform_1(%arg0: i32, %arg1: i32) -> (i32, i32) {
    %c1_i32 = arith.constant 1 : i32
    %0 = arith.addi %arg1, %c1_i32 : i32
    %c16_i32 = arith.constant 16 : i32
    %1 = arith.muli %0, %c16_i32 : i32
    %c0_i32 = arith.constant 0 : i32
    %c0_i32_0 = arith.constant 0 : i32
    return %1, %c0_i32 : i32, i32
  }
  func.func @transform_2(%arg0: i32, %arg1: i32) -> (i32, i32, i32) {
    %c0_i32 = arith.constant 0 : i32
    %c0_i32_0 = arith.constant 0 : i32
    %c0_i32_1 = arith.constant 0 : i32
    return %c0_i32, %c0_i32_0, %arg0 : i32, i32, i32
  }
  func.func @transform_3(%arg0: i32, %arg1: i32) -> (i32, i32) {
    %c0_i32 = arith.constant 0 : i32
    %c0_i32_0 = arith.constant 0 : i32
    return %c0_i32, %arg0 : i32, i32
  }
  func.func @transform_4(%arg0: i32, %arg1: i32) -> (i32, i32) {
    %c0_i32 = arith.constant 0 : i32
    return %arg1, %arg0 : i32, i32
  }
}

module attributes {stable_mosaic.version = 11 : i64} {
  func.func @_tail_kernel(%arg0: memref<4x8x384xbf16, #tpu.memory_space<vmem>>, %arg1: memref<384x128xbf16, #tpu.memory_space<vmem>>, %arg2: memref<1x128xf32, #tpu.memory_space<vmem>>, %arg3: memref<4x128x128xbf16, #tpu.memory_space<vmem>>, %arg4: memref<1x128xf32, #tpu.memory_space<vmem>>, %arg5: memref<128x128xbf16, #tpu.memory_space<vmem>>, %arg6: memref<1x128xf32, #tpu.memory_space<vmem>>, %arg7: memref<8x128xf32, #tpu.memory_space<vmem>>) attributes {dimension_semantics = [], scalar_prefetch = 0 : i64, scratch_operands = 0 : i64, tpu.core_type = #tpu.core_type<tc>} {
    %c0 = arith.constant 0 : index
    %c0_0 = arith.constant 0 : index
    %c0_1 = arith.constant 0 : index
    %0 = vector.load %arg0[%c0, %c0_0, %c0_1] : memref<4x8x384xbf16, #tpu.memory_space<vmem>>, vector<1x8x384xbf16>
    %1 = vector.shape_cast %0 : vector<1x8x384xbf16> to vector<8x384xbf16>
    %c0_2 = arith.constant 0 : index
    %c0_3 = arith.constant 0 : index
    %2 = vector.load %arg1[%c0_2, %c0_3] : memref<384x128xbf16, #tpu.memory_space<vmem>>, vector<384x128xbf16>
    %cst = arith.constant dense<0.000000e+00> : vector<8x128xf32>
    %3 = tpu.matmul %1, %2, %cst {dimension_numbers = #tpu.dot_dimension_numbers<[1], [0], [0], [1], [0, 0, 1, 1], [], []>} : vector<8x384xbf16>, vector<384x128xbf16>, vector<8x128xf32> -> vector<8x128xf32>
    %c0_4 = arith.constant 0 : index
    %c0_5 = arith.constant 0 : index
    %4 = vector.load %arg2[%c0_4, %c0_5] : memref<1x128xf32, #tpu.memory_space<vmem>>, vector<1x128xf32>
    %5 = vector.broadcast %4 : vector<1x128xf32> to vector<8x128xf32>
    %6 = arith.addf %3, %5 : vector<8x128xf32>
    %cst_6 = arith.constant 0.000000e+00 : f32
    %7 = vector.broadcast %cst_6 : f32 to vector<8x128xf32>
    %8 = arith.cmpf oge, %6, %7 : vector<8x128xf32>
    %cst_7 = arith.constant 0.00999999977 : f32
    %9 = vector.broadcast %cst_7 : f32 to vector<8x128xf32>
    %10 = arith.mulf %9, %6 : vector<8x128xf32>
    %11 = arith.select %8, %6, %10 : vector<8x128xi1>, vector<8x128xf32>
    %12 = arith.truncf %11 : vector<8x128xf32> to vector<8x128xbf16>
    %c0_8 = arith.constant 0 : index
    %c0_9 = arith.constant 0 : index
    %c0_10 = arith.constant 0 : index
    %13 = vector.load %arg3[%c0_8, %c0_9, %c0_10] : memref<4x128x128xbf16, #tpu.memory_space<vmem>>, vector<1x128x128xbf16>
    %14 = vector.shape_cast %13 : vector<1x128x128xbf16> to vector<128x128xbf16>
    %cst_11 = arith.constant dense<0.000000e+00> : vector<8x128xf32>
    %15 = tpu.matmul %12, %14, %cst_11 {dimension_numbers = #tpu.dot_dimension_numbers<[1], [0], [0], [1], [0, 0, 1, 1], [], []>} : vector<8x128xbf16>, vector<128x128xbf16>, vector<8x128xf32> -> vector<8x128xf32>
    %c1 = arith.constant 1 : index
    %c0_12 = arith.constant 0 : index
    %c0_13 = arith.constant 0 : index
    %16 = vector.load %arg0[%c1, %c0_12, %c0_13] : memref<4x8x384xbf16, #tpu.memory_space<vmem>>, vector<1x8x384xbf16>
    %17 = vector.shape_cast %16 : vector<1x8x384xbf16> to vector<8x384xbf16>
    %c0_14 = arith.constant 0 : index
    %c0_15 = arith.constant 0 : index
    %18 = vector.load %arg1[%c0_14, %c0_15] : memref<384x128xbf16, #tpu.memory_space<vmem>>, vector<384x128xbf16>
    %cst_16 = arith.constant dense<0.000000e+00> : vector<8x128xf32>
    %19 = tpu.matmul %17, %18, %cst_16 {dimension_numbers = #tpu.dot_dimension_numbers<[1], [0], [0], [1], [0, 0, 1, 1], [], []>} : vector<8x384xbf16>, vector<384x128xbf16>, vector<8x128xf32> -> vector<8x128xf32>
    %c0_17 = arith.constant 0 : index
    %c0_18 = arith.constant 0 : index
    %20 = vector.load %arg2[%c0_17, %c0_18] : memref<1x128xf32, #tpu.memory_space<vmem>>, vector<1x128xf32>
    %21 = vector.broadcast %20 : vector<1x128xf32> to vector<8x128xf32>
    %22 = arith.addf %19, %21 : vector<8x128xf32>
    %cst_19 = arith.constant 0.000000e+00 : f32
    %23 = vector.broadcast %cst_19 : f32 to vector<8x128xf32>
    %24 = arith.cmpf oge, %22, %23 : vector<8x128xf32>
    %cst_20 = arith.constant 0.00999999977 : f32
    %25 = vector.broadcast %cst_20 : f32 to vector<8x128xf32>
    %26 = arith.mulf %25, %22 : vector<8x128xf32>
    %27 = arith.select %24, %22, %26 : vector<8x128xi1>, vector<8x128xf32>
    %28 = arith.truncf %27 : vector<8x128xf32> to vector<8x128xbf16>
    %c1_21 = arith.constant 1 : index
    %c0_22 = arith.constant 0 : index
    %c0_23 = arith.constant 0 : index
    %29 = vector.load %arg3[%c1_21, %c0_22, %c0_23] : memref<4x128x128xbf16, #tpu.memory_space<vmem>>, vector<1x128x128xbf16>
    %30 = vector.shape_cast %29 : vector<1x128x128xbf16> to vector<128x128xbf16>
    %cst_24 = arith.constant dense<0.000000e+00> : vector<8x128xf32>
    %31 = tpu.matmul %28, %30, %cst_24 {dimension_numbers = #tpu.dot_dimension_numbers<[1], [0], [0], [1], [0, 0, 1, 1], [], []>} : vector<8x128xbf16>, vector<128x128xbf16>, vector<8x128xf32> -> vector<8x128xf32>
    %32 = arith.addf %15, %31 : vector<8x128xf32>
    %c2 = arith.constant 2 : index
    %c0_25 = arith.constant 0 : index
    %c0_26 = arith.constant 0 : index
    %33 = vector.load %arg0[%c2, %c0_25, %c0_26] : memref<4x8x384xbf16, #tpu.memory_space<vmem>>, vector<1x8x384xbf16>
    %34 = vector.shape_cast %33 : vector<1x8x384xbf16> to vector<8x384xbf16>
    %c0_27 = arith.constant 0 : index
    %c0_28 = arith.constant 0 : index
    %35 = vector.load %arg1[%c0_27, %c0_28] : memref<384x128xbf16, #tpu.memory_space<vmem>>, vector<384x128xbf16>
    %cst_29 = arith.constant dense<0.000000e+00> : vector<8x128xf32>
    %36 = tpu.matmul %34, %35, %cst_29 {dimension_numbers = #tpu.dot_dimension_numbers<[1], [0], [0], [1], [0, 0, 1, 1], [], []>} : vector<8x384xbf16>, vector<384x128xbf16>, vector<8x128xf32> -> vector<8x128xf32>
    %c0_30 = arith.constant 0 : index
    %c0_31 = arith.constant 0 : index
    %37 = vector.load %arg2[%c0_30, %c0_31] : memref<1x128xf32, #tpu.memory_space<vmem>>, vector<1x128xf32>
    %38 = vector.broadcast %37 : vector<1x128xf32> to vector<8x128xf32>
    %39 = arith.addf %36, %38 : vector<8x128xf32>
    %cst_32 = arith.constant 0.000000e+00 : f32
    %40 = vector.broadcast %cst_32 : f32 to vector<8x128xf32>
    %41 = arith.cmpf oge, %39, %40 : vector<8x128xf32>
    %cst_33 = arith.constant 0.00999999977 : f32
    %42 = vector.broadcast %cst_33 : f32 to vector<8x128xf32>
    %43 = arith.mulf %42, %39 : vector<8x128xf32>
    %44 = arith.select %41, %39, %43 : vector<8x128xi1>, vector<8x128xf32>
    %45 = arith.truncf %44 : vector<8x128xf32> to vector<8x128xbf16>
    %c2_34 = arith.constant 2 : index
    %c0_35 = arith.constant 0 : index
    %c0_36 = arith.constant 0 : index
    %46 = vector.load %arg3[%c2_34, %c0_35, %c0_36] : memref<4x128x128xbf16, #tpu.memory_space<vmem>>, vector<1x128x128xbf16>
    %47 = vector.shape_cast %46 : vector<1x128x128xbf16> to vector<128x128xbf16>
    %cst_37 = arith.constant dense<0.000000e+00> : vector<8x128xf32>
    %48 = tpu.matmul %45, %47, %cst_37 {dimension_numbers = #tpu.dot_dimension_numbers<[1], [0], [0], [1], [0, 0, 1, 1], [], []>} : vector<8x128xbf16>, vector<128x128xbf16>, vector<8x128xf32> -> vector<8x128xf32>
    %49 = arith.addf %32, %48 : vector<8x128xf32>
    %c3 = arith.constant 3 : index
    %c0_38 = arith.constant 0 : index
    %c0_39 = arith.constant 0 : index
    %50 = vector.load %arg0[%c3, %c0_38, %c0_39] : memref<4x8x384xbf16, #tpu.memory_space<vmem>>, vector<1x8x384xbf16>
    %51 = vector.shape_cast %50 : vector<1x8x384xbf16> to vector<8x384xbf16>
    %c0_40 = arith.constant 0 : index
    %c0_41 = arith.constant 0 : index
    %52 = vector.load %arg1[%c0_40, %c0_41] : memref<384x128xbf16, #tpu.memory_space<vmem>>, vector<384x128xbf16>
    %cst_42 = arith.constant dense<0.000000e+00> : vector<8x128xf32>
    %53 = tpu.matmul %51, %52, %cst_42 {dimension_numbers = #tpu.dot_dimension_numbers<[1], [0], [0], [1], [0, 0, 1, 1], [], []>} : vector<8x384xbf16>, vector<384x128xbf16>, vector<8x128xf32> -> vector<8x128xf32>
    %c0_43 = arith.constant 0 : index
    %c0_44 = arith.constant 0 : index
    %54 = vector.load %arg2[%c0_43, %c0_44] : memref<1x128xf32, #tpu.memory_space<vmem>>, vector<1x128xf32>
    %55 = vector.broadcast %54 : vector<1x128xf32> to vector<8x128xf32>
    %56 = arith.addf %53, %55 : vector<8x128xf32>
    %cst_45 = arith.constant 0.000000e+00 : f32
    %57 = vector.broadcast %cst_45 : f32 to vector<8x128xf32>
    %58 = arith.cmpf oge, %56, %57 : vector<8x128xf32>
    %cst_46 = arith.constant 0.00999999977 : f32
    %59 = vector.broadcast %cst_46 : f32 to vector<8x128xf32>
    %60 = arith.mulf %59, %56 : vector<8x128xf32>
    %61 = arith.select %58, %56, %60 : vector<8x128xi1>, vector<8x128xf32>
    %62 = arith.truncf %61 : vector<8x128xf32> to vector<8x128xbf16>
    %c3_47 = arith.constant 3 : index
    %c0_48 = arith.constant 0 : index
    %c0_49 = arith.constant 0 : index
    %63 = vector.load %arg3[%c3_47, %c0_48, %c0_49] : memref<4x128x128xbf16, #tpu.memory_space<vmem>>, vector<1x128x128xbf16>
    %64 = vector.shape_cast %63 : vector<1x128x128xbf16> to vector<128x128xbf16>
    %cst_50 = arith.constant dense<0.000000e+00> : vector<8x128xf32>
    %65 = tpu.matmul %62, %64, %cst_50 {dimension_numbers = #tpu.dot_dimension_numbers<[1], [0], [0], [1], [0, 0, 1, 1], [], []>} : vector<8x128xbf16>, vector<128x128xbf16>, vector<8x128xf32> -> vector<8x128xf32>
    %66 = arith.addf %49, %65 : vector<8x128xf32>
    %c0_51 = arith.constant 0 : index
    %c0_52 = arith.constant 0 : index
    %67 = vector.load %arg4[%c0_51, %c0_52] : memref<1x128xf32, #tpu.memory_space<vmem>>, vector<1x128xf32>
    %68 = vector.broadcast %67 : vector<1x128xf32> to vector<8x128xf32>
    %69 = arith.addf %66, %68 : vector<8x128xf32>
    %cst_53 = arith.constant 0.000000e+00 : f32
    %70 = vector.broadcast %cst_53 : f32 to vector<8x128xf32>
    %71 = arith.cmpf oge, %69, %70 : vector<8x128xf32>
    %cst_54 = arith.constant 0.00999999977 : f32
    %72 = vector.broadcast %cst_54 : f32 to vector<8x128xf32>
    %73 = arith.mulf %72, %69 : vector<8x128xf32>
    %74 = arith.select %71, %69, %73 : vector<8x128xi1>, vector<8x128xf32>
    %75 = arith.truncf %74 : vector<8x128xf32> to vector<8x128xbf16>
    %c0_55 = arith.constant 0 : index
    %c0_56 = arith.constant 0 : index
    %76 = vector.load %arg5[%c0_55, %c0_56] : memref<128x128xbf16, #tpu.memory_space<vmem>>, vector<128x128xbf16>
    %cst_57 = arith.constant dense<0.000000e+00> : vector<8x128xf32>
    %77 = tpu.matmul %75, %76, %cst_57 {dimension_numbers = #tpu.dot_dimension_numbers<[1], [0], [0], [1], [0, 0, 1, 1], [], []>} : vector<8x128xbf16>, vector<128x128xbf16>, vector<8x128xf32> -> vector<8x128xf32>
    %c0_58 = arith.constant 0 : index
    %c0_59 = arith.constant 0 : index
    %78 = vector.load %arg6[%c0_58, %c0_59] : memref<1x128xf32, #tpu.memory_space<vmem>>, vector<1x128xf32>
    %79 = vector.broadcast %78 : vector<1x128xf32> to vector<8x128xf32>
    %80 = arith.addf %77, %79 : vector<8x128xf32>
    %c0_60 = arith.constant 0 : index
    %c0_61 = arith.constant 0 : index
    %81 = vector.load %arg7[%c0_60, %c0_61] : memref<8x128xf32, #tpu.memory_space<vmem>>, vector<8x128xf32>
    tpu.vector_store %arg7[%c0_60, %c0_61], %80 {strides = array<i32>} : memref<8x128xf32, #tpu.memory_space<vmem>>, vector<8x128xf32>,
    return
  }
}

</mosaic_0001>

<bundles_post_ra>
// kernel: gradual_style_block.3
= control target key start
LH: loop header
LB: loop body
LE: loop exit
PB: predicated region body
PF: predicated region fallthrough
CT: control target
= control target key end

     0   :  { %s1801_s15 = smov 0   ;;  %s1803_s16 = smov 0   ;;  %s1987_s0 = inlined_call_operand.vmem [shape: bf16[384,16], index: 0, kind: input, shape index: {}, may-alias: {0,1}]   ;;  %s1988_s1 = inlined_call_operand.vmem [shape: bf16[384,16], index: 1, kind: input, shape index: {}, may-alias: {0,1}]   ;;  %s1989_s2 = inlined_call_operand.vmem [shape: bf16[4,16,128], index: 2, kind: input, shape index: {}]   ;;  %s1990_s3 = inlined_call_operand.vmem [shape: f32[1,128], index: 3, kind: input, shape index: {}]   ;;  %s1991_s4 = inlined_call_operand.vmem [shape: bf16[256,128], index: 4, kind: output, shape index: {}]  }
   0x1   :  { %s1805_s17 = smov 0  }
   0x2 LB: > { %s23_s18 = sadd.s32 1, %s1770_s16  ;;  %p1443_p0 = scmp.ge.s32.totalorder %s1774_s17, 1  ;;  %s1774_s17 = sphi %s1805_s17, %s14_s17   ;;  %s1770_s16 = sphi %s1803_s16, %s1993_s16   ;;  %s1766_s15 = sphi %s1801_s15, %s1992_s15  }
   0x3   : > { %p24_p1 = scmp.ge.s32.totalorder %s23_s18, 2  ;;  %p213_p2 = scmp.lt.s32.totalorder %s1774_s17, 3 }
   0x5   : > { %s1995_s18 = smov (%p24_p1, %s23_s18), 0  ;;  %p214_p3 = pnand %p1443_p0, %p213_p2 }
   0x6   : > { %s1825_s23 = sshll.u32 (!%p214_p3), %s1766_s15, 4 }
   0x7   : > { %217 = sbr.rel (%p214_p3) target bundleno = 299 (0x12b), region = 36  ;;  %p257_p4 = scmp.lt.s32.totalorder (!%p214_p3), %s1825_s23, 47 }
   0x8   : > { %s1719_s7 = sadd.s32 (!%p214_p3), 16, %s1825_s23  ;;  %p280_p6 = scmp.lt.s32.totalorder (!%p214_p3), %s1825_s23, 31 }
   0x9   : > { %p265_p5 = scmp.lt.s32.totalorder (!%p214_p3), %s1719_s7, 47 }
   0xc   : > { %v1650_v0 = vld [vmem:[%s1989_s2] sm:$0xff]  ;;  %v1677_v1 = vld [vmem:[%s1989_s2 + $0x18] sm:$0xff]  ;;  %v1659_v2 = vld [vmem:[%s1989_s2 + $0x8] sm:$0xff]  ;;  %s258_s28 = scalar_select %p257_p4, %s1825_s23, 47  ;;  %vm459_vm0 = vcmask 125952   ;;  %vm353_vm1 = vcmask 130048  }
   0xd   : > { %v1668_v3 = vld [vmem:[%s1989_s2 + $0x10] sm:$0xff]  ;;  %385 = vmatpush.bf16.msra.mxu0 %v1650_v0  ;;  %1131 = vmatpush.bf16.msra.mxu3 %v1677_v1  ;;  %vm1076_vm2 = vcmask 1046528   ;;  %vm559_vm3 = vsmask.f32 7424  ;;  %s1997_s7 = smov (!%p265_p5, %s1719_s7), 47  ;;  %s1999_s23 = smov (!%p280_p6, %s1825_s23), 31 }
   0xe   : > { %665 = vmatpush.bf16.msra.mxu1 %v1659_v2  ;;  %923 = vmatpush.bf16.msra.mxu2 %v1668_v3  ;;  %s1445_s29 = sshll.u32 %s258_s28, 2  ;;  %s1448_s8 = sshll.u32 %s1997_s7, 2 }
   0xf   : > { %s1838_s6 = scalar_lea.vmem %s1987_s0, %s1445_s29  ;;  %s268_s11 = scalar_lea.vmem %s1988_s1, %s1448_s8 }
  0x10   : > { %v1642_v4 = vld [vmem:[%s1838_s6] sm:$0xff]  ;;  %v445_v6 = vld [vmem:[%s1838_s6 + $0x8] sm:$0xf]  ;;  %v446_v7 = vld [vmem:[%s1838_s6 + $0xc] sm:$0xf]  ;;  %s1450_s14 = sshll.u32 %s1999_s23, 2 }
  0x11   : > { %v444_v5 = vld [vmem:[%s1838_s6 + $0x4] sm:$0xf]  ;;  %v447_v8 = vld [vmem:[%s1838_s6 + $0x10] sm:$0xf]  ;;  %1487 = vmatmul.msk.bf16.vlgmr.msra.gmra.mxu0 %vm353_vm1, %v1642_v4  ;;  %462 = vst.msk [vmem:[#allocation2 + $0x8] sm:$0xf] %vm459_vm0, %v445_v6  ;;  %s1954_s20 = scalar_lea.vmem %s1991_s4, %s1450_s14 }
  0x12   : > { %461 = vst.msk [vmem:[#allocation2 + $0x4] sm:$0xf] %vm459_vm0, %v444_v5  ;;  %v443_v9 = vld [vmem:[%s1838_s6] sm:$0xf]  ;;  %v448_v10 = vld [vmem:[%s1838_s6 + $0x14] sm:$0xf] }
  0x13   : > { %463 = vst.msk [vmem:[#allocation2 + $0xc] sm:$0xf] %vm459_vm0, %v446_v7  ;;  %v449_v11 = vld [vmem:[%s1838_s6 + $0x18] sm:$0xf]  ;;  %v450_v12 = vld [vmem:[%s1838_s6 + $0x1c] sm:$0xf] }
  0x14   : > { %464 = vst.msk [vmem:[#allocation2 + $0x10] sm:$0xf] %vm459_vm0, %v447_v8  ;;  %v451_v13 = vld [vmem:[%s1838_s6 + $0x20] sm:$0xf]  ;;  %v1643_v31 = vld [vmem:[%s1838_s6 + $0x8] sm:$0xff]  ;;  %v1644_v55 = vld [vmem:[%s1838_s6 + $0x10] sm:$0xff] }
  0x15   : > { %460 = vst.msk [vmem:[#allocation2] sm:$0xf] %vm459_vm0, %v443_v9  ;;  %v452_v42 = vld [vmem:[%s1838_s6 + $0x24] sm:$0xf]  ;;  %v453_v43 = vld [vmem:[%s1838_s6 + $0x28] sm:$0xf] }
  0x16   : > { %465 = vst.msk [vmem:[#allocation2 + $0x14] sm:$0xf] %vm459_vm0, %v448_v10  ;;  %v454_v60 = vld [vmem:[%s1838_s6 + $0x2c] sm:$0xf]  ;;  %v455_v61 = vld [vmem:[%s1838_s6 + $0x30] sm:$0xf] }
  0x17   : > { %466 = vst.msk [vmem:[#allocation2 + $0x18] sm:$0xf] %vm459_vm0, %v449_v11  ;;  %v1645_v9 = vld [vmem:[%s1838_s6 + $0x18] sm:$0xff] }
  0x18   : > { %467 = vst.msk [vmem:[#allocation2 + $0x1c] sm:$0xf] %vm459_vm0, %v450_v12  ;;  %v1669_v15 = vld [vmem:[#allocation2 + $0x4] sm:$0xf0] }
  0x19   : > { %v1591_v14 = vld [vmem:[#allocation2 + $0x4] sm:$0xe]  ;;  %468 = vst.msk [vmem:[#allocation2 + $0x20] sm:$0xf] %vm459_vm0, %v451_v13 }
  0x1a   : > { %v1660_v16 = vld [vmem:[#allocation2 + $0x4] sm:$0xff]  ;;  %v1592_v17 = vor.u32 %v1669_v15, %v1591_v14  ;;  %469 = vst.msk [vmem:[#allocation2 + $0x24] sm:$0xf] %vm459_vm0, %v452_v42  ;;  %v456_v14 = vld [vmem:[%s1838_s6 + $0x34] sm:$0xf] }
  0x1b   : > { %v1652_v18 = vld [vmem:[#allocation2 + $0x8] sm:$0xff]  ;;  %v819_v21 = vshrl.u32 %v1660_v16, 16  ;;  %v821_v22 = vshll.u32 %v1660_v16, 16  ;;  %470 = vst.msk [vmem:[#allocation2 + $0x28] sm:$0xf] %vm459_vm0, %v453_v43 }
  0x1c   : > { %v1670_v19 = vld [vmem:[#allocation2 + $0xc] sm:$0xff]  ;;  %v1077_v23 = vrot.slane %v1592_v17, 1  ;;  %v1651_v24 = vld [vmem:[#allocation2] sm:$0xff]  ;;  %v568_v25 = vshll.u32 %v1652_v18, 16  ;;  %v572_v48 = vshrl.u32 %v1652_v18, 16 }
  0x1d   : > { %v1661_v20 = vld [vmem:[#allocation2 + $0xc] sm:$0xff]  ;;  %v1078_v26 = vrot.slane %v1670_v19, 1  ;;  %v823_v27 = vrot.slane %v821_v22, 1  ;;  %v561_v29 = vshrl.u32 %v1651_v24, 16  ;;  %v563_v30 = vshll.u32 %v1651_v24, 16 }
  0x1e   : > { %v826_v28 = vshll.u32 %v1661_v20, 16  ;;  %v570_v36 = vrot.slane %v568_v25, 1  ;;  %v1662_v39 = vld [vmem:[#allocation2 + $0x14] sm:$0xff]  ;;  %v830_v45 = vshrl.u32 %v1661_v20, 16  ;;  %471 = vst.msk [vmem:[#allocation2 + $0x2c] sm:$0xf] %vm459_vm0, %v454_v60 }
  0x1f   : > { %v1079_v32 = vsel %vm1076_vm2, %v1077_v23, %v1078_v26  ;;  %v824_v33 = vor.u32 %v823_v27, %v819_v21  ;;  %v565_v35 = vrot.slane %v563_v30, 1  ;;  %v1671_v41 = vld [vmem:[#allocation2 + $0x14] sm:$0xff]  ;;  %v834_v46 = vshll.u32 %v1662_v39, 16  ;;  %472 = vst.msk [vmem:[#allocation2 + $0x30] sm:$0xf] %vm459_vm0, %v455_v61  ;;  %v1646_v27 = vld [vmem:[%s1838_s6 + $0x20] sm:$0xff] }
  0x20   : > { %v828_v34 = vrot.slane %v826_v28, 1  ;;  %1625 = vmatmul.msk.bf16.vlgmr.msra.gmra.mxu3 %vm353_vm1, %v1079_v32  ;;  %v1653_v44 = vld [vmem:[#allocation2 + $0x10] sm:$0xff]  ;;  %v1080_v47 = vrot.slane %v1671_v41, 1  ;;  %v574_v53 = vor.u32 %v572_v48, %v570_v36  ;;  %v1663_v58 = vld [vmem:[#allocation2 + $0x1c] sm:$0xff]  ;;  %v838_v63 = vshrl.u32 %v1662_v39, 16 }
  0x21   : > { %v566_v38 = vor.u32 %v565_v35, %v561_v29  ;;  %1488 = vmatmul.msk.bf16.gmra.mxu0 %vm353_vm1, %v1643_v31  ;;  %v576_v49 = vshll.u32 %v1653_v44, 16  ;;  %v836_v51 = vrot.slane %v834_v46, 1  ;;  %v1672_v59 = vld [vmem:[#allocation2 + $0x1c] sm:$0xff]  ;;  %v842_v0 = vshll.u32 %v1663_v58, 16  ;;  %v457_v15 = vld [vmem:[%s1838_s6 + $0x38] sm:$0xf] }
  0x22   : > { %v829_v37 = vsel %vm559_vm3, %v824_v33, %v828_v34  ;;  %v832_v50 = vor.u32 %v830_v45, %v828_v34  ;;  %v1081_v52 = vsel %vm1076_vm2, %v1078_v26, %v1080_v47  ;;  %v1654_v62 = vld [vmem:[#allocation2 + $0x18] sm:$0xff]  ;;  %v1082_v1 = vrot.slane %v1672_v59, 1  ;;  %v1664_v12 = vld [vmem:[#allocation2 + $0x24] sm:$0xff]  ;;  %473 = vst.msk [vmem:[#allocation2 + $0x34] sm:$0xf] %vm459_vm0, %v456_v14 }
  0x23   : > { %1579 = vmatmul.msk.bf16.vlgmr.msra.gmra.mxu2 %vm353_vm1, %v829_v37  ;;  %v571_v40 = vsel %vm559_vm3, %v566_v38, %v570_v36  ;;  %v578_v54 = vrot.slane %v576_v49, 1  ;;  %v580_v2 = vshrl.u32 %v1653_v44, 16  ;;  %v584_v3 = vshll.u32 %v1654_v62, 16  ;;  %v1673_v13 = vld [vmem:[#allocation2 + $0x24] sm:$0xff]  ;;  %474 = vst.msk [vmem:[#allocation2 + $0x38] sm:$0xf] %vm459_vm0, %v457_v15 }
  0x24   : > { %1533 = vmatmul.msk.bf16.vlgmr.msra.gmra.mxu1 %vm353_vm1, %v571_v40  ;;  %v837_v56 = vsel %vm559_vm3, %v832_v50, %v836_v51  ;;  %v840_v4 = vor.u32 %v838_v63, %v836_v51  ;;  %v844_v5 = vrot.slane %v842_v0, 1  ;;  %v1083_v6 = vsel %vm1076_vm2, %v1080_v47, %v1082_v1  ;;  %v1655_v16 = vld [vmem:[#allocation2 + $0x20] sm:$0xff]  ;;  %v458_v32 = vld [vmem:[%s1838_s6 + $0x3c] sm:$0xf]  ;;  %v1647_v45 = vld [vmem:[%s1838_s6 + $0x28] sm:$0xff] }
  0x25   : > { %v579_v57 = vsel %vm559_vm3, %v574_v53, %v578_v54  ;;  %v582_v7 = vor.u32 %v580_v2, %v578_v54  ;;  %v586_v8 = vrot.slane %v584_v3, 1  ;;  %v846_v17 = vshrl.u32 %v1663_v58, 16  ;;  %v476_v33 = vld [vmem:[%s268_s11] sm:$0xf]  ;;  %v1656_v34 = vld [vmem:[#allocation2 + $0x28] sm:$0xff]  ;;  %v1649_v15 = vld [vmem:[%s1838_s6 + $0x38] sm:$0xff] }
  0x26   : > { %v845_v10 = vsel %vm559_vm3, %v840_v4, %v844_v5  ;;  %v850_v18 = vshll.u32 %v1664_v12, 16  ;;  %v1084_v19 = vrot.slane %v1673_v13, 1  ;;  %v588_v20 = vshrl.u32 %v1654_v62, 16  ;;  %v1665_v30 = vld [vmem:[#allocation2 + $0x2c] sm:$0xff]  ;;  %475 = vst.msk [vmem:[#allocation2 + $0x3c] sm:$0xf] %vm459_vm0, %v458_v32 }
  0x27   : > { %v587_v11 = vsel %vm559_vm3, %v582_v7, %v586_v8  ;;  %v592_v21 = vshll.u32 %v1655_v16, 16  ;;  %v848_v22 = vor.u32 %v846_v17, %v844_v5  ;;  %v1674_v31 = vld [vmem:[#allocation2 + $0x2c] sm:$0xff]  ;;  %v854_v35 = vshrl.u32 %v1664_v12, 16  ;;  %478 = vst.msk [vmem:[#allocation2 + $0x40] sm:$0xf] %vm459_vm0, %v476_v33 }
  0x28   : > { %v852_v23 = vrot.slane %v850_v18, 1  ;;  %v1085_v24 = vsel %vm1076_vm2, %v1082_v1, %v1084_v19  ;;  %v590_v25 = vor.u32 %v588_v20, %v586_v8  ;;  %v858_v36 = vshll.u32 %v1665_v30, 16  ;;  %v477_v48 = vld [vmem:[%s268_s11 + $0x4] sm:$0xf]  ;;  %v1648_v62 = vld [vmem:[%s1838_s6 + $0x30] sm:$0xff] }
  0x29   : > { %v594_v26 = vrot.slane %v592_v21, 1  ;;  %v1086_v37 = vrot.slane %v1674_v31, 1  ;;  %v596_v38 = vshrl.u32 %v1655_v16, 16  ;;  %v600_v39 = vshll.u32 %v1656_v34, 16  ;;  %479 = vst.msk [vmem:[#allocation2 + $0x44] sm:$0xf] %vm459_vm0, %v477_v48 }
  0x2a   : > { %v853_v28 = vsel %vm559_vm3, %v848_v22, %v852_v23  ;;  %v856_v40 = vor.u32 %v854_v35, %v852_v23  ;;  %v860_v41 = vrot.slane %v858_v36, 1  ;;  %v1666_v49 = vld [vmem:[#allocation2 + $0x34] sm:$0xff]  ;;  %v1945_v48 = vld [vmem:[%s1990_s3] ss:$0 sm:$0xff] }
  0x2b   : > { %v595_v29 = vsel %vm559_vm3, %v590_v25, %v594_v26  ;;  %v1087_v42 = vsel %vm1076_vm2, %v1084_v19, %v1086_v37  ;;  %v598_v43 = vor.u32 %v596_v38, %v594_v26  ;;  %v602_v44 = vrot.slane %v600_v39, 1  ;;  %v1675_v50 = vld [vmem:[#allocation2 + $0x34] sm:$0xff] }
  0x2c   : > { %v861_v46 = vsel %vm559_vm3, %v856_v40, %v860_v41  ;;  %v1657_v51 = vld [vmem:[#allocation2 + $0x30] sm:$0xff]  ;;  %v866_v53 = vshll.u32 %v1666_v49, 16  ;;  %v1088_v54 = vrot.slane %v1675_v50, 1  ;;  %v870_v4 = vshrl.u32 %v1666_v49, 16 }
  0x2d   : > { %v603_v47 = vsel %vm559_vm3, %v598_v43, %v602_v44  ;;  %v1658_v3 = vld [vmem:[#allocation2 + $0x38] sm:$0xff]  ;;  %v612_v7 = vshrl.u32 %v1657_v51, 16 }
  0x2e   : > { %v868_v58 = vrot.slane %v866_v53, 1  ;;  %v1089_v59 = vsel %vm1076_vm2, %v1086_v37, %v1088_v54  ;;  %v1667_v1 = vld [vmem:[#allocation2 + $0x3c] sm:$0xff]  ;;  %v616_v8 = vshll.u32 %v1658_v3, 16 }
  0x2f   : > { %v1676_v2 = vld [vmem:[#allocation2 + $0x3c] sm:$0xff]  ;;  %v874_v5 = vshll.u32 %v1667_v1, 16  ;;  %v878_v26 = vshrl.u32 %v1667_v1, 16 }
  0x30   : > { %1626 = vmatmul.msk.bf16.gmra.mxu3 %vm353_vm1, %v1081_v52  ;;  %v862_v52 = vshrl.u32 %v1665_v30, 16  ;;  %v618_v14 = vrot.slane %v616_v8, 1  ;;  %v1029_v16 = vld [vmem:[#allocation2 + $0x44] sm:$0x1]  ;;  %v512_v18 = vld [vmem:[#allocation2 + $0x40] sm:$0x1] }
  0x31   : > { %1489 = vmatmul.msk.bf16.gmra.mxu0 %vm353_vm1, %v1644_v55  ;;  %v604_v55 = vshrl.u32 %v1656_v34, 16  ;;  %v1066_v20 = vunpack.c.l.b16 %v1029_v16  ;;  %v549_v22 = vunpack.c.l.b16 %v512_v18 }
  0x33   : > { %1580 = vmatmul.msk.bf16.gmra.mxu2 %vm353_vm1, %v837_v56  ;;  %v608_v56 = vshll.u32 %v1657_v51, 16  ;;  %v606_v60 = vor.u32 %v604_v55, %v602_v44  ;;  %v558_v25 = vpack.c.b16 %v549_v22, %v549_v22 }
  0x34   : > { %1534 = vmatmul.msk.bf16.gmra.mxu1 %vm353_vm1, %v579_v57  ;;  %v864_v57 = vor.u32 %v862_v52, %v860_v41 }
  0x35   : > { %v610_v61 = vrot.slane %v608_v56, 1  ;;  %v624_v30 = vshll.u32 %v558_v25, 16 }
  0x36   : > { %v869_v63 = vsel %vm559_vm3, %v864_v57, %v868_v58 }
  0x37   : > { %v611_v0 = vsel %vm559_vm3, %v606_v60, %v610_v61  ;;  %v614_v13 = vor.u32 %v612_v7, %v610_v61  ;;  %v626_v35 = vrot.slane %v624_v30, 1 }
  0x39   : > { %v619_v21 = vsel %vm559_vm3, %v614_v13, %v618_v14 }
  0x40   : > { %1627 = vmatmul.msk.bf16.gmra.mxu3 %vm353_vm1, %v1083_v6  ;;  %v1090_v6 = vrot.slane %v1676_v2, 1 }
  0x41   : > { %1490 = vmatmul.msk.bf16.gmra.mxu0 %vm353_vm1, %v1645_v9  ;;  %v872_v9 = vor.u32 %v870_v4, %v868_v58 }
  0x42   : > { %v1091_v12 = vsel %vm1076_vm2, %v1088_v54, %v1090_v6 }
  0x43   : > { %1581 = vmatmul.msk.bf16.gmra.mxu2 %vm353_vm1, %v845_v10  ;;  %v876_v10 = vrot.slane %v874_v5, 1 }
  0x44   : > { %1535 = vmatmul.msk.bf16.gmra.mxu1 %vm353_vm1, %v587_v11  ;;  %v771_v11 = vld [vmem:[#allocation2 + $0x44] sm:$0x1] }
  0x45   : > { %v877_v17 = vsel %vm559_vm3, %v872_v9, %v876_v10  ;;  %v808_v19 = vunpack.c.l.b16 %v771_v11  ;;  %v880_v31 = vor.u32 %v878_v26, %v876_v10 }
  0x47   : > { %v817_v23 = vpack.c.b16 %v808_v19, %v808_v19 }
  0x50   : > { %1628 = vmatmul.msk.bf16.gmra.mxu3 %vm353_vm1, %v1085_v24  ;;  %v1075_v24 = vpack.c.b16 %v1066_v20, %v1066_v20 }
  0x51   : > { %1491 = vmatmul.msk.bf16.gmra.mxu0 %vm353_vm1, %v1646_v27  ;;  %v882_v27 = vshll.u32 %v817_v23, 16 }
  0x53   : > { %1582 = vmatmul.msk.bf16.gmra.mxu2 %vm353_vm1, %v853_v28  ;;  %v1092_v28 = vrot.slane %v1075_v24, 1  ;;  %v884_v32 = vrot.slane %v882_v27, 1 }
  0x54   : > { %1536 = vmatmul.msk.bf16.gmra.mxu1 %vm353_vm1, %v595_v29  ;;  %v620_v29 = vshrl.u32 %v1658_v3, 16 }
  0x55   : > { %v1093_v33 = vsel %vm1076_vm2, %v1090_v6, %v1092_v28  ;;  %v885_v36 = vsel %vm559_vm3, %v880_v31, %v884_v32 }
  0x56   : > { %v622_v34 = vor.u32 %v620_v29, %v618_v14 }
  0x58   : > { %v627_v38 = vsel %vm559_vm3, %v622_v34, %v626_v35 }
  0x60   : > { %1629 = vmatmul.msk.bf16.gmra.mxu3 %vm353_vm1, %v1087_v42 }
  0x61   : > { %1492 = vmatmul.msk.bf16.gmra.mxu0 %vm353_vm1, %v1647_v45 }
  0x63   : > { %1583 = vmatmul.msk.bf16.gmra.mxu2 %vm353_vm1, %v861_v46 }
  0x64   : > { %1537 = vmatmul.msk.bf16.gmra.mxu1 %vm353_vm1, %v603_v47 }
  0x70   : > { %1630 = vmatmul.msk.bf16.gmra.mxu3 %vm353_vm1, %v1089_v59 }
  0x71   : > { %1493 = vmatmul.msk.bf16.gmra.mxu0 %vm353_vm1, %v1648_v62 }
  0x73   : > { %1584 = vmatmul.msk.bf16.gmra.mxu2 %vm353_vm1, %v869_v63 }
  0x74   : > { %1538 = vmatmul.msk.bf16.gmra.mxu1 %vm353_vm1, %v611_v0 }
  0x80   : > { %1631 = vmatmul.msk.bf16.gmra.mxu3 %vm353_vm1, %v1091_v12 }
  0x81   : > { %1494 = vmatmul.msk.bf16.gmra.mxu0 %vm353_vm1, %v1649_v15 }
  0x83   : > { %1585 = vmatmul.msk.bf16.gmra.mxu2 %vm353_vm1, %v877_v17 }
  0x84   : > { %1539 = vmatmul.msk.bf16.gmra.mxu1 %vm353_vm1, %v619_v21 }
  0x8e   : > { %v387_v37 = vpop.f32.mrf.mxu0 }
  0x90   : > { %1632 = vmatmul.msk.bf16.gmra.mxu3 %vm353_vm1, %v1093_v33 }
  0x93   : > { %1586 = vmatmul.msk.bf16.gmra.mxu2 %vm353_vm1, %v885_v36 }
  0x94   : > { %1540 = vmatmul.msk.bf16.gmra.mxu1 %vm353_vm1, %v627_v38 }
  0x96   : > { %v389_v39 = vpop.f32.mrf.mxu0 }
  0x9e   : > { %v392_v40 = vpop.f32.mrf.mxu0 }
  0xa1   : > { %v667_v41 = vpop.f32.mrf.mxu1 }
  0xa2   : > { %v707_v42 = vadd.f32 %v667_v41, %v387_v37 }
  0xa3   : > { %v1133_v43 = vpop.f32.mrf.mxu3 }
  0xa6   : > { %v925_v44 = vpop.f32.mrf.mxu2  ;;  %v394_v46 = vpop.f32.mrf.mxu0 }
  0xa7   : > { %v965_v45 = vadd.f32 %v925_v44, %v707_v42 }
  0xa9   : > { %v1173_v47 = vadd.f32 %v1133_v43, %v965_v45  ;;  %v669_v49 = vpop.f32.mrf.mxu1 }
  0xaa   : > { %v708_v51 = vadd.f32 %v669_v49, %v389_v39 }
  0xab   : > { %v1135_v50 = vpop.f32.mrf.mxu3  ;;  %v1225_v53 = vadd.f32 %v1945_v48, %v1173_v47 }
  0xad   : > { %v1257_v57 = vmul.f32 0.01, %v1225_v53  ;;  %vm1241_vm4 = vcmp.ge.f32.partialorder %v1225_v53, 0.0 }
  0xae   : > { %v927_v52 = vpop.f32.mrf.mxu2  ;;  %v397_v55 = vpop.f32.mrf.mxu0 }
  0xaf   : > { %v966_v54 = vadd.f32 %v927_v52, %v708_v51  ;;  %v1273_v0 = vsel %vm1241_vm4, %v1225_v53, %v1257_v57 }
  0xb1   : > { %v1174_v56 = vadd.f32 %v1135_v50, %v966_v54  ;;  %v672_v59 = vpop.f32.mrf.mxu1 }
  0xb2   : > { %v709_v60 = vadd.f32 %v672_v59, %v392_v40 }
  0xb3   : > { %v1226_v58 = vadd.f32 %v1945_v48, %v1174_v56  ;;  %v1138_v61 = vpop.f32.mrf.mxu3 }
  0xb5   : > { %vm1242_vm5 = vcmp.ge.f32.partialorder %v1226_v58, 0.0  ;;  %v1258_v62 = vmul.f32 0.01, %v1226_v58 }
  0xb6   : > { %v930_v63 = vpop.f32.mrf.mxu2  ;;  %v399_v4 = vpop.f32.mrf.mxu0 }
  0xb7   : > { %v1274_v1 = vsel %vm1242_vm5, %v1226_v58, %v1258_v62  ;;  %v967_v2 = vadd.f32 %v930_v63, %v709_v60 }
  0xb8   : > { %v1681_v3 = vpack.c.bf16 %v1274_v1, %v1273_v0 }
  0xb9   : > { %v1175_v5 = vadd.f32 %v1138_v61, %v967_v2  ;;  %v674_v6 = vpop.f32.mrf.mxu1 }
  0xba   : > { %1682 = vst [vmem:[%s1954_s20] sm:$0xff] %v1681_v3   ;;  %v710_v8 = vadd.f32 %v674_v6, %v394_v46 }
  0xbb   : > { %v1140_v7 = vpop.f32.mrf.mxu3  ;;  %v1227_v10 = vadd.f32 %v1945_v48, %v1175_v5 }
  0xbd   : > { %v1259_v14 = vmul.f32 0.01, %v1227_v10  ;;  %vm1243_vm6 = vcmp.ge.f32.partialorder %v1227_v10, 0.0 }
  0xbe   : > { %v932_v9 = vpop.f32.mrf.mxu2  ;;  %v402_v13 = vpop.f32.mrf.mxu0 }
  0xbf   : > { %v968_v11 = vadd.f32 %v932_v9, %v710_v8  ;;  %v1275_v21 = vsel %vm1243_vm6, %v1227_v10, %v1259_v14 }
  0xc1   : > { %v1176_v12 = vadd.f32 %v1140_v7, %v968_v11  ;;  %v677_v16 = vpop.f32.mrf.mxu1 }
  0xc2   : > { %v711_v17 = vadd.f32 %v677_v16, %v397_v55 }
  0xc3   : > { %v1228_v15 = vadd.f32 %v1945_v48, %v1176_v12  ;;  %v1143_v18 = vpop.f32.mrf.mxu3 }
  0xc5   : > { %vm1244_vm7 = vcmp.ge.f32.partialorder %v1228_v15, 0.0  ;;  %v1260_v19 = vmul.f32 0.01, %v1228_v15 }
  0xc6   : > { %v935_v20 = vpop.f32.mrf.mxu2  ;;  %v404_v28 = vpop.f32.mrf.mxu0 }
  0xc7   : > { %v1276_v22 = vsel %vm1244_vm7, %v1228_v15, %v1260_v19  ;;  %v969_v23 = vadd.f32 %v935_v20, %v711_v17 }
  0xc8   : > { %v1686_v24 = vpack.c.bf16 %v1276_v22, %v1275_v21 }
  0xc9   : > { %v1177_v25 = vadd.f32 %v1143_v18, %v969_v23  ;;  %v679_v26 = vpop.f32.mrf.mxu1 }
  0xca   : > { %1720 = vst [vmem:[%s1954_s20 + $0x8] sm:$0xff] %v1686_v24   ;;  %v712_v29 = vadd.f32 %v679_v26, %v399_v4 }
  0xcb   : > { %v1145_v27 = vpop.f32.mrf.mxu3  ;;  %v1229_v31 = vadd.f32 %v1945_v48, %v1177_v25 }
  0xcd   : > { %v1261_v34 = vmul.f32 0.01, %v1229_v31  ;;  %vm1245_vm8 = vcmp.ge.f32.partialorder %v1229_v31, 0.0 }
  0xce   : > { %v937_v30 = vpop.f32.mrf.mxu2  ;;  %v407_v41 = vpop.f32.mrf.mxu0 }
  0xcf   : > { %v970_v32 = vadd.f32 %v937_v30, %v712_v29  ;;  %v1277_v42 = vsel %vm1245_vm8, %v1229_v31, %v1261_v34 }
  0xd1   : > { %v1178_v33 = vadd.f32 %v1145_v27, %v970_v32  ;;  %v682_v36 = vpop.f32.mrf.mxu1 }
  0xd2   : > { %v713_v37 = vadd.f32 %v682_v36, %v402_v13 }
  0xd3   : > { %v1230_v35 = vadd.f32 %v1945_v48, %v1178_v33  ;;  %v1148_v38 = vpop.f32.mrf.mxu3 }
  0xd5   : > { %vm1246_vm9 = vcmp.ge.f32.partialorder %v1230_v35, 0.0  ;;  %v1262_v39 = vmul.f32 0.01, %v1230_v35 }
  0xd6   : > { %v940_v40 = vpop.f32.mrf.mxu2  ;;  %v409_v54 = vpop.f32.mrf.mxu0 }
  0xd7   : > { %v1278_v43 = vsel %vm1246_vm9, %v1230_v35, %v1262_v39  ;;  %v971_v44 = vadd.f32 %v940_v40, %v713_v37 }
  0xd8   : > { %v1691_v45 = vpack.c.bf16 %v1278_v43, %v1277_v42 }
  0xd9   : > { %v1179_v46 = vadd.f32 %v1148_v38, %v971_v44  ;;  %v684_v47 = vpop.f32.mrf.mxu1 }
  0xda   : > { %1721 = vst [vmem:[%s1954_s20 + $0x10] sm:$0xff] %v1691_v45   ;;  %v714_v50 = vadd.f32 %v684_v47, %v404_v28 }
  0xdb   : > { %v1150_v49 = vpop.f32.mrf.mxu3  ;;  %v1231_v52 = vadd.f32 %v1945_v48, %v1179_v46 }
  0xdd   : > { %v1263_v56 = vmul.f32 0.01, %v1231_v52  ;;  %vm1247_vm10 = vcmp.ge.f32.partialorder %v1231_v52, 0.0 }
  0xde   : > { %v942_v51 = vpop.f32.mrf.mxu2  ;;  %v412_v3 = vpop.f32.mrf.mxu0 }
  0xdf   : > { %v972_v53 = vadd.f32 %v942_v51, %v714_v50  ;;  %v1279_v63 = vsel %vm1247_vm10, %v1231_v52, %v1263_v56 }
  0xe1   : > { %v1180_v55 = vadd.f32 %v1150_v49, %v972_v53  ;;  %v687_v58 = vpop.f32.mrf.mxu1 }
  0xe2   : > { %v715_v59 = vadd.f32 %v687_v58, %v407_v41 }
  0xe3   : > { %v1232_v57 = vadd.f32 %v1945_v48, %v1180_v55  ;;  %v1153_v60 = vpop.f32.mrf.mxu3 }
  0xe5   : > { %vm1248_vm11 = vcmp.ge.f32.partialorder %v1232_v57, 0.0  ;;  %v1264_v61 = vmul.f32 0.01, %v1232_v57 }
  0xe6   : > { %v945_v62 = vpop.f32.mrf.mxu2  ;;  %v414_v17 = vpop.f32.mrf.mxu0 }
  0xe7   : > { %v1280_v0 = vsel %vm1248_vm11, %v1232_v57, %v1264_v61  ;;  %v973_v1 = vadd.f32 %v945_v62, %v715_v59 }
  0xe8   : > { %v1696_v2 = vpack.c.bf16 %v1280_v0, %v1279_v63 }
  0xe9   : > { %v1181_v4 = vadd.f32 %v1153_v60, %v973_v1  ;;  %v689_v5 = vpop.f32.mrf.mxu1 }
  0xea   : > { %1722 = vst [vmem:[%s1954_s20 + $0x18] sm:$0xff] %v1696_v2   ;;  %v716_v7 = vadd.f32 %v689_v5, %v409_v54 }
  0xeb   : > { %v1155_v6 = vpop.f32.mrf.mxu3  ;;  %v1233_v9 = vadd.f32 %v1945_v48, %v1181_v4 }
  0xed   : > { %v1265_v12 = vmul.f32 0.01, %v1233_v9  ;;  %vm1249_vm12 = vcmp.ge.f32.partialorder %v1233_v9, 0.0 }
  0xee   : > { %v947_v8 = vpop.f32.mrf.mxu2  ;;  %v417_v28 = vpop.f32.mrf.mxu0 }
  0xef   : > { %v974_v10 = vadd.f32 %v947_v8, %v716_v7  ;;  %v1281_v20 = vsel %vm1249_vm12, %v1233_v9, %v1265_v12 }
  0xf1   : > { %v1182_v11 = vadd.f32 %v1155_v6, %v974_v10  ;;  %v692_v14 = vpop.f32.mrf.mxu1 }
  0xf2   : > { %v717_v15 = vadd.f32 %v692_v14, %v412_v3 }
  0xf3   : > { %v1234_v13 = vadd.f32 %v1945_v48, %v1182_v11  ;;  %v1158_v16 = vpop.f32.mrf.mxu3 }
  0xf5   : > { %vm1250_vm13 = vcmp.ge.f32.partialorder %v1234_v13, 0.0  ;;  %v1266_v18 = vmul.f32 0.01, %v1234_v13 }
  0xf6   : > { %v950_v19 = vpop.f32.mrf.mxu2  ;;  %v419_v44 = vpop.f32.mrf.mxu0 }
  0xf7   : > { %v1282_v21 = vsel %vm1250_vm13, %v1234_v13, %v1266_v18  ;;  %v975_v22 = vadd.f32 %v950_v19, %v717_v15 }
  0xf8   : > { %v1701_v23 = vpack.c.bf16 %v1282_v21, %v1281_v20 }
  0xf9   : > { %v1183_v24 = vadd.f32 %v1158_v16, %v975_v22  ;;  %v694_v25 = vpop.f32.mrf.mxu1 }
  0xfa   : > { %1723 = vst [vmem:[%s1954_s20 + $0x20] sm:$0xff] %v1701_v23   ;;  %v718_v27 = vadd.f32 %v694_v25, %v414_v17 }
  0xfb   : > { %v1160_v26 = vpop.f32.mrf.mxu3  ;;  %v1235_v30 = vadd.f32 %v1945_v48, %v1183_v24 }
  0xfd   : > { %v1267_v33 = vmul.f32 0.01, %v1235_v30  ;;  %vm1251_vm14 = vcmp.ge.f32.partialorder %v1235_v30, 0.0 }
  0xfe   : > { %v952_v29 = vpop.f32.mrf.mxu2  ;;  %v422_v54 = vpop.f32.mrf.mxu0 }
  0xff   : > { %v976_v31 = vadd.f32 %v952_v29, %v718_v27  ;;  %v1283_v40 = vsel %vm1251_vm14, %v1235_v30, %v1267_v33 }
 0x101   : > { %v1184_v32 = vadd.f32 %v1160_v26, %v976_v31  ;;  %v697_v35 = vpop.f32.mrf.mxu1 }
 0x102   : > { %v719_v36 = vadd.f32 %v697_v35, %v417_v28 }
 0x103   : > { %v1236_v34 = vadd.f32 %v1945_v48, %v1184_v32  ;;  %v1163_v37 = vpop.f32.mrf.mxu3 }
 0x105   : > { %vm1252_vm15 = vcmp.ge.f32.partialorder %v1236_v34, 0.0  ;;  %v1268_v38 = vmul.f32 0.01, %v1236_v34 }
 0x106   : > { %v955_v39 = vpop.f32.mrf.mxu2  ;;  %v424_v4 = vpop.f32.mrf.mxu0 }
 0x107   : > { %v1284_v41 = vsel %vm1252_vm15, %v1236_v34, %v1268_v38  ;;  %v977_v42 = vadd.f32 %v955_v39, %v719_v36 }
 0x108   : > { %v1706_v43 = vpack.c.bf16 %v1284_v41, %v1283_v40 }
 0x109   : > { %v1185_v45 = vadd.f32 %v1163_v37, %v977_v42  ;;  %v699_v46 = vpop.f32.mrf.mxu1 }
 0x10a   : > { %1724 = vst [vmem:[%s1954_s20 + $0x28] sm:$0xff] %v1706_v43   ;;  %v720_v49 = vadd.f32 %v699_v46, %v419_v44 }
 0x10b   : > { %v1165_v47 = vpop.f32.mrf.mxu3  ;;  %v1237_v51 = vadd.f32 %v1945_v48, %v1185_v45 }
 0x10d   : > { %v1269_v55 = vmul.f32 0.01, %v1237_v51  ;;  %vm1253_vm0 = vcmp.ge.f32.partialorder %v1237_v51, 0.0 }
 0x10e   : > { %v957_v50 = vpop.f32.mrf.mxu2 }
 0x10f   : > { %v978_v52 = vadd.f32 %v957_v50, %v720_v49  ;;  %v1285_v62 = vsel %vm1253_vm0, %v1237_v51, %v1269_v55 }
 0x111   : > { %v1186_v53 = vadd.f32 %v1165_v47, %v978_v52  ;;  %v702_v57 = vpop.f32.mrf.mxu1 }
 0x112   : > { %v721_v58 = vadd.f32 %v702_v57, %v422_v54 }
 0x113   : > { %v1238_v56 = vadd.f32 %v1945_v48, %v1186_v53  ;;  %v1168_v60 = vpop.f32.mrf.mxu3 }
 0x115   : > { %vm1254_vm1 = vcmp.ge.f32.partialorder %v1238_v56, 0.0  ;;  %v1270_v59 = vmul.f32 0.01, %v1238_v56 }
 0x116   : > { %v960_v61 = vpop.f32.mrf.mxu2 }
 0x117   : > { %v1286_v63 = vsel %vm1254_vm1, %v1238_v56, %v1270_v59  ;;  %v979_v0 = vadd.f32 %v960_v61, %v721_v58 }
 0x118   : > { %v1711_v1 = vpack.c.bf16 %v1286_v63, %v1285_v62 }
 0x119   : > { %v1187_v2 = vadd.f32 %v1168_v60, %v979_v0  ;;  %v704_v3 = vpop.f32.mrf.mxu1 }
 0x11a   : > { %1725 = vst [vmem:[%s1954_s20 + $0x30] sm:$0xff] %v1711_v1   ;;  %v722_v5 = vadd.f32 %v704_v3, %v424_v4 }
 0x11b   : > { %v1239_v7 = vadd.f32 %v1945_v48, %v1187_v2  ;;  %v1170_v9 = vpop.f32.mrf.mxu3 }
 0x11d   : > { %v1271_v11 = vmul.f32 0.01, %v1239_v7  ;;  %vm1255_vm2 = vcmp.ge.f32.partialorder %v1239_v7, 0.0 }
 0x11e   : > { %v962_v6 = vpop.f32.mrf.mxu2 }
 0x11f   : > { %v980_v8 = vadd.f32 %v962_v6, %v722_v5  ;;  %v1287_v14 = vsel %vm1255_vm2, %v1239_v7, %v1271_v11 }
 0x121   : > { %v1188_v10 = vadd.f32 %v1170_v9, %v980_v8 }
 0x123   : > { %v1240_v12 = vadd.f32 %v1945_v48, %v1188_v10 }
 0x125   : > { %vm1256_vm3 = vcmp.ge.f32.partialorder %v1240_v12, 0.0  ;;  %v1272_v13 = vmul.f32 0.01, %v1240_v12 }
 0x127   : > { %v1288_v15 = vsel %vm1256_vm3, %v1240_v12, %v1272_v13 }
 0x128   : > { %v1716_v16 = vpack.c.bf16 %v1288_v15, %v1287_v14 }
 0x12a   : > { %1726 = vst [vmem:[%s1954_s20 + $0x38] sm:$0xff] %v1716_v16  }
 0x12b PF: > { %s14_s17 = sadd.s32 1, %s1774_s17   ;;  %s1992_s15 = smov %s1770_s16 }
 0x12c   : > { %p11_p7 = scmp.ge.s32.totalorder %s14_s17, 4   ;;  %s1993_s16 = smov %s1995_s18 }
 0x12e   :  { %13 = sbr.rel (!%p11_p7) target bundleno = 2 (0x2), region = 78 }

// kernel: gradual_style_block.5
= control target key start
LH: loop header
LB: loop body
LE: loop exit
PB: predicated region body
PF: predicated region fallthrough
CT: control target
= control target key end

     0   :  { %s1656_s1 = inlined_call_operand.vmem [shape: bf16[384,128], index: 1, kind: input, shape index: {}]   ;;  %s1657_s2 = inlined_call_operand.vmem [shape: f32[1,128], index: 2, kind: input, shape index: {}]   ;;  %s1658_s0 = inlined_call_operand.vmem [shape: bf16[4,8,384], index: 0, kind: input, shape index: {}]   ;;  %s1659_s3 = inlined_call_operand.vmem [shape: bf16[4,128,128], index: 3, kind: input, shape index: {}]   ;;  %s1660_s5 = inlined_call_operand.vmem [shape: bf16[128,128], index: 5, kind: input, shape index: {}]   ;;  %s1661_s4 = inlined_call_operand.vmem [shape: f32[1,128], index: 4, kind: input, shape index: {}]   ;;  %s1662_s6 = inlined_call_operand.vmem [shape: f32[1,128], index: 6, kind: input, shape index: {}]   ;;  %s1663_s7 = inlined_call_operand.vmem [shape: f32[8,128], index: 7, kind: output, shape index: {}]  }
   0x1   :  { %v1277_v0 = vld [vmem:[%s1656_s1 + $0x38] sm:$0xff]  ;;  %v1294_v3 = vld [vmem:[%s1656_s1 + $0x30] sm:$0xff]  ;;  %v1313_v6 = vld [vmem:[%s1656_s1 + $0x28] sm:$0xff] }
   0x2   :  { %v1282_v1 = vld [vmem:[%s1656_s1 + $0x78] sm:$0xff]  ;;  %235 = vmatpush.bf16.msra.mxu0 %v1277_v0  ;;  %v1299_v4 = vld [vmem:[%s1656_s1 + $0x70] sm:$0xff]  ;;  %308 = vmatpush.bf16.msra.mxu3 %v1277_v0  ;;  %v1318_v7 = vld [vmem:[%s1656_s1 + $0x68] sm:$0xff] }
   0x3   :  { %v1287_v2 = vld [vmem:[%s1656_s1 + $0xb8] sm:$0xff]  ;;  %248 = vmatpush.bf16.msra.mxu1 %v1282_v1  ;;  %v1305_v5 = vld [vmem:[%s1656_s1 + $0xb0] sm:$0xff]  ;;  %v1324_v8 = vld [vmem:[%s1656_s1 + $0xa8] sm:$0xff] }
   0x4   :  { %261 = vmatpush.bf16.msra.mxu2 %v1287_v2  ;;  %v1332_v9 = vld [vmem:[%s1656_s1 + $0x20] sm:$0xff]  ;;  %v1351_v12 = vld [vmem:[%s1656_s1 + $0x18] sm:$0xff]  ;;  %v1370_v15 = vld [vmem:[%s1656_s1 + $0x10] sm:$0xff] }
   0x5   :  { %v1337_v10 = vld [vmem:[%s1656_s1 + $0x60] sm:$0xff]  ;;  %v1356_v13 = vld [vmem:[%s1656_s1 + $0x58] sm:$0xff]  ;;  %v1375_v16 = vld [vmem:[%s1656_s1 + $0x50] sm:$0xff] }
   0x6   :  { %236 = vmatpush.bf16.msra.mxu0 %v1294_v3  ;;  %309 = vmatpush.bf16.msra.mxu3 %v1294_v3  ;;  %v1343_v11 = vld [vmem:[%s1656_s1 + $0xa0] sm:$0xff]  ;;  %v1362_v14 = vld [vmem:[%s1656_s1 + $0x98] sm:$0xff]  ;;  %v1381_v17 = vld [vmem:[%s1656_s1 + $0x90] sm:$0xff] }
   0x7   :  { %249 = vmatpush.bf16.msra.mxu1 %v1299_v4  ;;  %v1389_v18 = vld [vmem:[%s1656_s1 + $0x8] sm:$0xff]  ;;  %v26_v20 = vld [vmem:[%s1658_s0] sm:$0xff]  ;;  %v1198_v35 = vld [vmem:[%s1659_s3 + $0x38] sm:$0xff] }
   0x8   :  { %262 = vmatpush.bf16.msra.mxu2 %v1305_v5  ;;  %v1394_v19 = vld [vmem:[%s1656_s1 + $0x48] sm:$0xff]  ;;  %v82_v24 = vunpack.c.l.b16 %v26_v20  ;;  %v83_v25 = vunpack.c.h.b16 %v26_v20  ;;  %v1419_v26 = vld [vmem:[%s1656_s1] sm:$0xff]  ;;  %v1206_v36 = vld [vmem:[%s1659_s3 + $0x78] sm:$0xff] }
   0x9   :  { %v1403_v21 = vld [vmem:[%s1656_s1 + $0x88] sm:$0xff]  ;;  %v1424_v27 = vld [vmem:[%s1656_s1 + $0x40] sm:$0xff]  ;;  %v1197_v37 = vld [vmem:[%s1659_s3 + $0x30] sm:$0xff] }
   0xa   :  { %237 = vmatpush.bf16.msra.mxu0 %v1313_v6  ;;  %310 = vmatpush.bf16.msra.mxu3 %v1313_v6  ;;  %v27_v22 = vld [vmem:[%s1658_s0 + $0x8] sm:$0xf]  ;;  %v1412_v23 = vld [vmem:[%s1658_s0 + $0xc] sm:$0xff]  ;;  %v1430_v29 = vld [vmem:[%s1656_s1 + $0x80] sm:$0xff]  ;;  %v85_v31 = vpack.c.b16 %v82_v24, %v82_v24  ;;  %v86_v32 = vpack.c.b16 %v83_v25, %v83_v25 }
   0xb   :  { %250 = vmatpush.bf16.msra.mxu1 %v1318_v7  ;;  %v84_v28 = vunpack.c.l.b16 %v27_v22  ;;  %v299_v30 = vunpack.c.l.b16 %v1412_v23  ;;  %v1205_v38 = vld [vmem:[%s1659_s3 + $0x70] sm:$0xff]  ;;  %v1196_v39 = vld [vmem:[%s1659_s3 + $0x28] sm:$0xff]  ;;  %v1195_v41 = vld [vmem:[%s1659_s3 + $0x20] sm:$0xff]  ;;  %v300_v47 = vunpack.c.h.b16 %v1412_v23 }
   0xc   :  { %263 = vmatpush.bf16.msra.mxu2 %v1324_v8  ;;  %v1204_v40 = vld [vmem:[%s1659_s3 + $0x68] sm:$0xff]  ;;  %v1203_v42 = vld [vmem:[%s1659_s3 + $0x60] sm:$0xff]  ;;  %v1194_v43 = vld [vmem:[%s1659_s3 + $0x18] sm:$0xff] }
   0xd   :  { %v87_v33 = vpack.c.b16 %v84_v28, %v84_v28  ;;  %v302_v34 = vpack.c.b16 %v299_v30, %v299_v30  ;;  %v1202_v44 = vld [vmem:[%s1659_s3 + $0x58] sm:$0xff]  ;;  %v954_v45 = vld [vmem:[%s1658_s0 + $0x14] sm:$0xf]  ;;  %v303_v49 = vpack.c.b16 %v300_v47, %v300_v47  ;;  %v1200_v52 = vld [vmem:[%s1659_s3 + $0x48] sm:$0xff] }
   0xe   :  { %238 = vmatpush.bf16.msra.mxu0 %v1332_v9  ;;  %311 = vmatpush.bf16.msra.mxu3 %v1332_v9  ;;  %v1201_v46 = vld [vmem:[%s1659_s3 + $0x50] sm:$0xff]  ;;  %v301_v48 = vunpack.c.l.b16 %v954_v45  ;;  %v1192_v53 = vld [vmem:[%s1659_s3 + $0x8] sm:$0xff]  ;;  %v1199_v54 = vld [vmem:[%s1659_s3 + $0x40] sm:$0xff] }
   0xf   :  { %251 = vmatpush.bf16.msra.mxu1 %v1337_v10  ;;  %v1193_v51 = vld [vmem:[%s1659_s3 + $0x10] sm:$0xff]  ;;  %v1191_v55 = vld [vmem:[%s1659_s3] sm:$0xff] }
  0x10   :  { %264 = vmatpush.bf16.msra.mxu2 %v1343_v11  ;;  %v304_v50 = vpack.c.b16 %v301_v48, %v301_v48  ;;  %v1546_v56 = vld [vmem:[%s1657_s2] ss:$0 sm:$0xff]  ;;  %v1085_v20 = vld [vmem:[%s1658_s0 + $0x24] sm:$0xff]  ;;  %v1221_v45 = vld [vmem:[%s1659_s3 + $0xf0] sm:$0xff] }
  0x11   :  { %v631_v24 = vunpack.c.l.b16 %v1085_v20 }
  0x12   :  { %239 = vmatpush.bf16.msra.mxu0 %v1351_v12  ;;  %312 = vmatpush.bf16.msra.mxu3 %v1351_v12 }
  0x13   :  { %252 = vmatpush.bf16.msra.mxu1 %v1356_v13 }
  0x14   :  { %265 = vmatpush.bf16.msra.mxu2 %v1362_v14 }
  0x16   :  { %240 = vmatpush.bf16.msra.mxu0 %v1370_v15  ;;  %313 = vmatpush.bf16.msra.mxu3 %v1370_v15 }
  0x17   :  { %253 = vmatpush.bf16.msra.mxu1 %v1375_v16 }
  0x18   :  { %266 = vmatpush.bf16.msra.mxu2 %v1381_v17 }
  0x1a   :  { %241 = vmatpush.bf16.msra.mxu0 %v1389_v18  ;;  %314 = vmatpush.bf16.msra.mxu3 %v1389_v18 }
  0x1b   :  { %254 = vmatpush.bf16.msra.mxu1 %v1394_v19 }
  0x1c   :  { %267 = vmatpush.bf16.msra.mxu2 %v1403_v21 }
  0x1e   :  { %242 = vmatpush.bf16.msra.mxu0 %v1419_v26  ;;  %315 = vmatpush.bf16.msra.mxu3 %v1419_v26 }
  0x1f   :  { %255 = vmatpush.bf16.msra.mxu1 %v1424_v27 }
  0x20   :  { %268 = vmatpush.bf16.msra.mxu2 %v1430_v29 }
  0x21   :  { %243 = vmatmul.bf16.vlgmr.msra.gmra.mxu0 %v85_v31  ;;  %316 = vmatmul.bf16.vlgmr.msra.gmra.mxu3 %v302_v34 }
  0x22   :  { %321 = vmatpush.bf16.msrb.mxu0 %v1282_v1  ;;  %256 = vmatmul.bf16.vlgmr.msra.gmra.mxu1 %v86_v32 }
  0x23   :  { %334 = vmatpush.bf16.msrb.mxu1 %v1287_v2  ;;  %269 = vmatmul.bf16.vlgmr.msra.gmra.mxu2 %v87_v33 }
  0x24   :  { %477 = vmatpush.bf16.msrb.mxu3 %v1198_v35  ;;  %416 = vmatpush.bf16.msrb.mxu2 %v1206_v36  ;;  %v1036_v35 = vld [vmem:[%s1658_s0 + $0x20] sm:$0xf] }
  0x25   :  { %v497_v36 = vunpack.c.l.b16 %v1036_v35 }
  0x26   :  { %322 = vmatpush.bf16.msrb.mxu0 %v1299_v4 }
  0x27   :  { %335 = vmatpush.bf16.msrb.mxu1 %v1305_v5 }
  0x28   :  { %478 = vmatpush.bf16.msrb.mxu3 %v1197_v37  ;;  %417 = vmatpush.bf16.msrb.mxu2 %v1205_v38  ;;  %v500_v37 = vpack.c.b16 %v497_v36, %v497_v36 }
  0x2a   :  { %323 = vmatpush.bf16.msrb.mxu0 %v1318_v7 }
  0x2b   :  { %336 = vmatpush.bf16.msrb.mxu1 %v1324_v8 }
  0x2c   :  { %479 = vmatpush.bf16.msrb.mxu3 %v1196_v39  ;;  %418 = vmatpush.bf16.msrb.mxu2 %v1204_v40  ;;  %v1208_v39 = vld [vmem:[%s1659_s3 + $0x88] sm:$0xff] }
  0x2e   :  { %324 = vmatpush.bf16.msrb.mxu0 %v1337_v10 }
  0x2f   :  { %337 = vmatpush.bf16.msrb.mxu1 %v1343_v11 }
  0x30   :  { %480 = vmatpush.bf16.msrb.mxu3 %v1195_v41  ;;  %419 = vmatpush.bf16.msrb.mxu2 %v1203_v42  ;;  %v1207_v42 = vld [vmem:[%s1659_s3 + $0x80] sm:$0xff] }
  0x32   :  { %325 = vmatpush.bf16.msrb.mxu0 %v1356_v13 }
  0x33   :  { %338 = vmatpush.bf16.msrb.mxu1 %v1362_v14 }
  0x34   :  { %481 = vmatpush.bf16.msrb.mxu3 %v1194_v43  ;;  %420 = vmatpush.bf16.msrb.mxu2 %v1202_v44  ;;  %v1222_v44 = vld [vmem:[%s1659_s3 + $0xf8] sm:$0xff] }
  0x36   :  { %326 = vmatpush.bf16.msrb.mxu0 %v1375_v16 }
  0x37   :  { %339 = vmatpush.bf16.msrb.mxu1 %v1381_v17 }
  0x38   :  { %421 = vmatpush.bf16.msrb.mxu2 %v1201_v46  ;;  %482 = vmatpush.bf16.msrb.mxu3 %v1193_v51 }
  0x3a   :  { %327 = vmatpush.bf16.msrb.mxu0 %v1394_v19 }
  0x3b   :  { %340 = vmatpush.bf16.msrb.mxu1 %v1403_v21 }
  0x3c   :  { %422 = vmatpush.bf16.msrb.mxu2 %v1200_v52  ;;  %483 = vmatpush.bf16.msrb.mxu3 %v1192_v53  ;;  %v1218_v53 = vld [vmem:[%s1659_s3 + $0xd8] sm:$0xff] }
  0x3e   :  { %328 = vmatpush.bf16.msrb.mxu0 %v1424_v27 }
  0x3f   :  { %341 = vmatpush.bf16.msrb.mxu1 %v1430_v29 }
  0x40   :  { %423 = vmatpush.bf16.msrb.mxu2 %v1199_v54  ;;  %484 = vmatpush.bf16.msrb.mxu3 %v1191_v55  ;;  %v1217_v54 = vld [vmem:[%s1659_s3 + $0xd0] sm:$0xff] }
  0x41   :  { %329 = vmatmul.bf16.vlgmr.msrb.gmra.mxu0 %v303_v49  ;;  %v1220_v49 = vld [vmem:[%s1659_s3 + $0xe8] sm:$0xff] }
  0x42   :  { %504 = vmatpush.bf16.msra.mxu0 %v1277_v0  ;;  %342 = vmatmul.bf16.vlgmr.msrb.gmra.mxu1 %v304_v50  ;;  %v1219_v50 = vld [vmem:[%s1659_s3 + $0xe0] sm:$0xff] }
  0x43   :  { %517 = vmatpush.bf16.msra.mxu1 %v1282_v1 }
  0x44   :  { %530 = vmatpush.bf16.msra.mxu2 %v1287_v2 }
  0x46   :  { %505 = vmatpush.bf16.msra.mxu0 %v1294_v3 }
  0x47   :  { %518 = vmatpush.bf16.msra.mxu1 %v1299_v4 }
  0x48   :  { %531 = vmatpush.bf16.msra.mxu2 %v1305_v5 }
  0x4a   :  { %506 = vmatpush.bf16.msra.mxu0 %v1313_v6 }
  0x4b   :  { %519 = vmatpush.bf16.msra.mxu1 %v1318_v7 }
  0x4c   :  { %532 = vmatpush.bf16.msra.mxu2 %v1324_v8 }
  0x4e   :  { %507 = vmatpush.bf16.msra.mxu0 %v1332_v9 }
  0x4f   :  { %520 = vmatpush.bf16.msra.mxu1 %v1337_v10 }
  0x50   :  { %533 = vmatpush.bf16.msra.mxu2 %v1343_v11 }
  0x52   :  { %508 = vmatpush.bf16.msra.mxu0 %v1351_v12 }
  0x53   :  { %521 = vmatpush.bf16.msra.mxu1 %v1356_v13 }
  0x54   :  { %534 = vmatpush.bf16.msra.mxu2 %v1362_v14 }
  0x56   :  { %509 = vmatpush.bf16.msra.mxu0 %v1370_v15 }
  0x57   :  { %522 = vmatpush.bf16.msra.mxu1 %v1375_v16 }
  0x58   :  { %535 = vmatpush.bf16.msra.mxu2 %v1381_v17 }
  0x5a   :  { %510 = vmatpush.bf16.msra.mxu0 %v1389_v18 }
  0x5b   :  { %523 = vmatpush.bf16.msra.mxu1 %v1394_v19 }
  0x5c   :  { %536 = vmatpush.bf16.msra.mxu2 %v1403_v21 }
  0x5e   :  { %511 = vmatpush.bf16.msra.mxu0 %v1419_v26 }
  0x5f   :  { %524 = vmatpush.bf16.msra.mxu1 %v1424_v27 }
  0x60   :  { %537 = vmatpush.bf16.msra.mxu2 %v1430_v29 }
  0x62   :  { %640 = vmatpush.bf16.msrb.mxu0 %v1277_v0 }
  0x63   :  { %653 = vmatpush.bf16.msrb.mxu1 %v1282_v1 }
  0x66   :  { %641 = vmatpush.bf16.msrb.mxu0 %v1294_v3 }
  0x67   :  { %654 = vmatpush.bf16.msrb.mxu1 %v1299_v4 }
  0x6a   :  { %642 = vmatpush.bf16.msrb.mxu0 %v1313_v6 }
  0x6b   :  { %655 = vmatpush.bf16.msrb.mxu1 %v1318_v7  ;;  %v1035_v7 = vld [vmem:[%s1658_s0 + $0x18] sm:$0xff] }
  0x6e   :  { %643 = vmatpush.bf16.msrb.mxu0 %v1332_v9  ;;  %v495_v9 = vunpack.c.l.b16 %v1035_v7 }
  0x6f   :  { %656 = vmatpush.bf16.msrb.mxu1 %v1337_v10 }
  0x72   :  { %644 = vmatpush.bf16.msrb.mxu0 %v1351_v12  ;;  %v498_v12 = vpack.c.b16 %v495_v9, %v495_v9 }
  0x73   :  { %657 = vmatpush.bf16.msrb.mxu1 %v1356_v13  ;;  %v496_v13 = vunpack.c.h.b16 %v1035_v7 }
  0x74   :  { %512 = vmatmul.bf16.vlgmr.msra.gmra.mxu0 %v498_v12 }
  0x76   :  { %645 = vmatpush.bf16.msrb.mxu0 %v1370_v15 }
  0x77   :  { %658 = vmatpush.bf16.msrb.mxu1 %v1375_v16  ;;  %v499_v16 = vpack.c.b16 %v496_v13, %v496_v13 }
  0x79   :  { %525 = vmatmul.bf16.vlgmr.msra.gmra.mxu1 %v499_v16 }
  0x7a   :  { %646 = vmatpush.bf16.msrb.mxu0 %v1389_v18 }
  0x7b   :  { %659 = vmatpush.bf16.msrb.mxu1 %v1394_v19 }
  0x7e   :  { %647 = vmatpush.bf16.msrb.mxu0 %v1419_v26  ;;  %v634_v26 = vpack.c.b16 %v631_v24, %v631_v24  ;;  %v1228_v24 = vld [vmem:[%s1660_s5 + $0x28] sm:$0xff] }
  0x7f   :  { %660 = vmatpush.bf16.msrb.mxu1 %v1424_v27  ;;  %v632_v27 = vunpack.c.h.b16 %v1085_v20 }
  0x81   :  { %v635_v30 = vpack.c.b16 %v632_v27, %v632_v27  ;;  %v1224_v27 = vld [vmem:[%s1660_s5 + $0x8] sm:$0xff] }
  0x84   :  { %648 = vmatmul.bf16.vlgmr.msrb.gmra.mxu0 %v634_v26  ;;  %v1225_v26 = vld [vmem:[%s1660_s5 + $0x10] sm:$0xff] }
  0x89   :  { %661 = vmatmul.bf16.vlgmr.msrb.gmra.mxu1 %v635_v30 }
  0x9e   :  { %v244_v57 = vpop.f32.mrf.mxu0 }
  0x9f   :  { %v257_v58 = vpop.f32.mrf.mxu1  ;;  %v245_v59 = vadd.f32 %v1546_v56, %v244_v57 }
  0xa1   :  { %v258_v60 = vadd.f32 %v257_v58, %v245_v59  ;;  %v1216_v59 = vld [vmem:[%s1659_s3 + $0xc8] sm:$0xff] }
  0xa4   :  { %v317_v1 = vpop.f32.mrf.mxu3 }
  0xa5   :  { %v318_v18 = vadd.f32 %v1546_v56, %v317_v1  ;;  %v1229_v1 = vld [vmem:[%s1660_s5 + $0x30] sm:$0xff] }
  0xa6   :  { %v270_v61 = vpop.f32.mrf.mxu2  ;;  %v246_v63 = vpop.f32.mrf.mxu0 }
  0xa7   :  { %v271_v62 = vadd.f32 %v270_v61, %v258_v60  ;;  %v259_v0 = vpop.f32.mrf.mxu1  ;;  %v1215_v61 = vld [vmem:[%s1659_s3 + $0xc0] sm:$0xff]  ;;  %v1230_v63 = vld [vmem:[%s1660_s5 + $0x38] sm:$0xff] }
  0xa8   :  { %839 = vmatpush.bf16.msra.mxu0 %v1230_v63 }
  0xa9   :  { %vm274_vm0 = vcmp.ge.f32.partialorder %v271_v62, 0.0  ;;  %v275_v3 = vmul.f32 0.01, %v271_v62 }
  0xab   :  { %v276_v4 = vsel %vm274_vm0, %v271_v62, %v275_v3 }
  0xac   :  { %v277_v6 = vpack.c.bf16 %v276_v4, %v276_v4  ;;  %v319_v15 = vpop.f32.mrf.mxu3  ;;  %840 = vmatpush.bf16.msra.mxu0 %v1229_v1 }
  0xae   :  { %485 = vmatmul.bf16.vlgmr.msrb.gmra.mxu3 %v277_v6  ;;  %v272_v10 = vpop.f32.mrf.mxu2 }
  0xb0   :  { %841 = vmatpush.bf16.msra.mxu0 %v1228_v24 }
  0xbe   :  { %v330_v19 = vpop.f32.mrf.mxu0 }
  0xbf   :  { %v331_v22 = vadd.f32 %v330_v19, %v318_v18  ;;  %v343_v23 = vpop.f32.mrf.mxu1 }
  0xc1   :  { %v344_v25 = vadd.f32 %v343_v23, %v331_v22 }
  0xc3   :  { %vm347_vm1 = vcmp.ge.f32.partialorder %v344_v25, 0.0  ;;  %v348_v28 = vmul.f32 0.01, %v344_v25 }
  0xc5   :  { %v349_v31 = vsel %vm347_vm1, %v344_v25, %v348_v28  ;;  %v1227_v25 = vld [vmem:[%s1660_s5 + $0x20] sm:$0xff] }
  0xc6   :  { %v332_v32 = vpop.f32.mrf.mxu0  ;;  %v350_v33 = vpack.c.bf16 %v349_v31, %v349_v31  ;;  %842 = vmatpush.bf16.msra.mxu0 %v1227_v25  ;;  %v1223_v28 = vld [vmem:[%s1660_s5] sm:$0xff] }
  0xc7   :  { %v345_v34 = vpop.f32.mrf.mxu1 }
  0xc8   :  { %424 = vmatmul.bf16.vlgmr.msrb.gmra.mxu2 %v350_v33  ;;  %v1232_v33 = vld [vmem:[%s1661_s4] ss:$0 sm:$0xff] }
  0xc9   :  { %666 = vmatpush.bf16.msrb.mxu2 %v1287_v2  ;;  %v1086_v2 = vld [vmem:[%s1658_s0 + $0x2c] sm:$0xf] }
  0xcd   :  { %667 = vmatpush.bf16.msrb.mxu2 %v1305_v5  ;;  %v633_v5 = vunpack.c.l.b16 %v1086_v2 }
  0xcf   :  { %v636_v38 = vpack.c.b16 %v633_v5, %v633_v5 }
  0xd1   :  { %668 = vmatpush.bf16.msrb.mxu2 %v1324_v8  ;;  %v1214_v8 = vld [vmem:[%s1659_s3 + $0xb8] sm:$0xff] }
  0xd2   :  { %612 = vmatpush.bf16.msra.mxu3 %v1214_v8  ;;  %v1233_v8 = vld [vmem:[%s1662_s6] ss:$0 sm:$0xff] }
  0xd5   :  { %669 = vmatpush.bf16.msrb.mxu2 %v1343_v11  ;;  %v1213_v11 = vld [vmem:[%s1659_s3 + $0xb0] sm:$0xff] }
  0xd6   :  { %613 = vmatpush.bf16.msra.mxu3 %v1213_v11 }
  0xd8   :  { %538 = vmatmul.bf16.vlgmr.msra.gmra.mxu2 %v500_v37 }
  0xd9   :  { %670 = vmatpush.bf16.msrb.mxu2 %v1362_v14  ;;  %v1212_v14 = vld [vmem:[%s1659_s3 + $0xa8] sm:$0xff] }
  0xda   :  { %614 = vmatpush.bf16.msra.mxu3 %v1212_v14 }
  0xdd   :  { %671 = vmatpush.bf16.msrb.mxu2 %v1381_v17  ;;  %v1211_v17 = vld [vmem:[%s1659_s3 + $0xa0] sm:$0xff] }
  0xde   :  { %615 = vmatpush.bf16.msra.mxu3 %v1211_v17 }
  0xe1   :  { %672 = vmatpush.bf16.msrb.mxu2 %v1403_v21  ;;  %v1210_v21 = vld [vmem:[%s1659_s3 + $0x98] sm:$0xff] }
  0xe2   :  { %616 = vmatpush.bf16.msra.mxu3 %v1210_v21 }
  0xe5   :  { %673 = vmatpush.bf16.msrb.mxu2 %v1430_v29  ;;  %v1209_v29 = vld [vmem:[%s1659_s3 + $0x90] sm:$0xff] }
  0xe6   :  { %617 = vmatpush.bf16.msra.mxu3 %v1209_v29 }
  0xe8   :  { %674 = vmatmul.bf16.vlgmr.msrb.gmra.mxu2 %v636_v38 }
  0xea   :  { %618 = vmatpush.bf16.msra.mxu3 %v1208_v39 }
  0xee   :  { %619 = vmatpush.bf16.msra.mxu3 %v1207_v42 }
  0xf1   :  { %v513_v40 = vpop.f32.mrf.mxu0 }
  0xf2   :  { %748 = vmatpush.bf16.msrb.mxu3 %v1222_v44  ;;  %v514_v0 = vadd.f32 %v1546_v56, %v513_v40 }
  0xf6   :  { %v526_v41 = vpop.f32.mrf.mxu1  ;;  %749 = vmatpush.bf16.msrb.mxu3 %v1221_v45 }
  0xf7   :  { %v527_v3 = vadd.f32 %v526_v41, %v514_v0 }
  0xf9   :  { %v515_v46 = vpop.f32.mrf.mxu0 }
  0xfa   :  { %750 = vmatpush.bf16.msrb.mxu3 %v1220_v49 }
  0xfe   :  { %v528_v47 = vpop.f32.mrf.mxu1  ;;  %751 = vmatpush.bf16.msrb.mxu3 %v1219_v50 }
 0x101   :  { %v649_v51 = vpop.f32.mrf.mxu0 }
 0x102   :  { %752 = vmatpush.bf16.msrb.mxu3 %v1218_v53  ;;  %v650_v13 = vadd.f32 %v1546_v56, %v649_v51  ;;  %v1226_v56 = vld [vmem:[%s1660_s5 + $0x18] sm:$0xff] }
 0x103   :  { %843 = vmatpush.bf16.msra.mxu0 %v1226_v56 }
 0x106   :  { %v662_v52 = vpop.f32.mrf.mxu1  ;;  %753 = vmatpush.bf16.msrb.mxu3 %v1217_v54 }
 0x107   :  { %v663_v15 = vadd.f32 %v662_v52, %v650_v13  ;;  %844 = vmatpush.bf16.msra.mxu0 %v1225_v26 }
 0x109   :  { %v651_v55 = vpop.f32.mrf.mxu0 }
 0x10a   :  { %754 = vmatpush.bf16.msrb.mxu3 %v1216_v59 }
 0x10b   :  { %845 = vmatpush.bf16.msra.mxu0 %v1224_v27 }
 0x10e   :  { %v664_v57 = vpop.f32.mrf.mxu1  ;;  %755 = vmatpush.bf16.msrb.mxu3 %v1215_v61 }
 0x10f   :  { %846 = vmatpush.bf16.msra.mxu0 %v1223_v28 }
 0x131   :  { %v486_v43 = vpop.f32.mrf.mxu3 }
 0x139   :  { %v488_v48 = vpop.f32.mrf.mxu3 }
 0x14b   :  { %v425_v58 = vpop.f32.mrf.mxu2 }
 0x14c   :  { %v487_v60 = vadd.f32 %v486_v43, %v425_v58 }
 0x153   :  { %v427_v62 = vpop.f32.mrf.mxu2 }
 0x15b   :  { %v539_v4 = vpop.f32.mrf.mxu2 }
 0x15c   :  { %v540_v6 = vadd.f32 %v539_v4, %v527_v3 }
 0x15e   :  { %vm543_vm2 = vcmp.ge.f32.partialorder %v540_v6, 0.0  ;;  %v544_v7 = vmul.f32 0.01, %v540_v6 }
 0x160   :  { %v545_v9 = vsel %vm543_vm2, %v540_v6, %v544_v7 }
 0x161   :  { %v546_v10 = vpack.c.bf16 %v545_v9, %v545_v9 }
 0x163   :  { %v541_v12 = vpop.f32.mrf.mxu2  ;;  %620 = vmatmul.bf16.vlgmr.msra.gmra.mxu3 %v546_v10 }
 0x16b   :  { %v675_v16 = vpop.f32.mrf.mxu2 }
 0x16c   :  { %v676_v18 = vadd.f32 %v675_v16, %v663_v15 }
 0x16e   :  { %vm679_vm3 = vcmp.ge.f32.partialorder %v676_v18, 0.0  ;;  %v680_v19 = vmul.f32 0.01, %v676_v18 }
 0x170   :  { %v681_v20 = vsel %vm679_vm3, %v676_v18, %v680_v19 }
 0x171   :  { %v682_v22 = vpack.c.bf16 %v681_v20, %v681_v20 }
 0x173   :  { %v677_v23 = vpop.f32.mrf.mxu2  ;;  %756 = vmatmul.bf16.vlgmr.msrb.gmra.mxu3 %v682_v22 }
 0x1e6   :  { %v621_v30 = vpop.f32.mrf.mxu3 }
 0x1e7   :  { %v625_v32 = vadd.f32 %v621_v30, %v487_v60 }
 0x1ee   :  { %v623_v31 = vpop.f32.mrf.mxu3 }
 0x1f6   :  { %v757_v34 = vpop.f32.mrf.mxu3 }
 0x1f7   :  { %v761_v35 = vadd.f32 %v757_v34, %v625_v32 }
 0x1f9   :  { %v766_v36 = vadd.f32 %v1232_v33, %v761_v35 }
 0x1fb   :  { %vm767_vm4 = vcmp.ge.f32.partialorder %v766_v36, 0.0  ;;  %v768_v37 = vmul.f32 0.01, %v766_v36 }
 0x1fd   :  { %v769_v2 = vsel %vm767_vm4, %v766_v36, %v768_v37 }
 0x1fe   :  { %v770_v5 = vpack.c.bf16 %v769_v2, %v769_v2  ;;  %v759_v38 = vpop.f32.mrf.mxu3 }
 0x200   :  { %847 = vmatmul.bf16.vlgmr.msra.gmra.mxu0 %v770_v5 }
 0x27d   :  { %v848_v11 = vpop.f32.mrf.mxu0 }
 0x27e   :  { %v849_v14 = vadd.f32 %v1233_v8, %v848_v11 }
 0x280   :  { %852 = vst [vmem:[%s1663_s7] sm:$0xff] %v849_v14 }
 0x285   :  { %v850_v17 = vpop.f32.mrf.mxu0 }

// kernel: gradual_style_block.4
= control target key start
LH: loop header
LB: loop body
LE: loop exit
PB: predicated region body
PF: predicated region fallthrough
CT: control target
= control target key end

     0   :  { %vm359_vm0 = vsmask.f32 7424  ;;  %vm658_vm1 = vsmask.f32 5376  ;;  %vm969_vm2 = vcmask 1044480   ;;  %s1912_s2 = inlined_call_operand.vmem [shape: bf16[4,128,128], index: 2, kind: input, shape index: {}]   ;;  %s1913_s0 = inlined_call_operand.vmem [shape: bf16[256,128], index: 0, kind: input, shape index: {}, may-alias: {0,1}]   ;;  %s1914_s3 = inlined_call_operand.vmem [shape: f32[1,128], index: 3, kind: input, shape index: {}]   ;;  %s1915_s1 = inlined_call_operand.vmem [shape: bf16[256,128], index: 1, kind: input, shape index: {}, may-alias: {0,1}]   ;;  %s1916_s4 = inlined_call_operand.vmem [shape: bf16[128,128], index: 4, kind: output, shape index: {}]  }
   0x1   :  { %v1570_v0 = vld [vmem:[%s1912_s2 + $0x38] sm:$0xff]  ;;  %v1569_v4 = vld [vmem:[%s1912_s2 + $0x30] sm:$0xff]  ;;  %v1568_v8 = vld [vmem:[%s1912_s2 + $0x28] sm:$0xff] }
   0x2   :  { %v1586_v1 = vld [vmem:[%s1912_s2 + $0x78] sm:$0xff]  ;;  %167 = vmatpush.bf16.msra.mxu0 %v1570_v0  ;;  %v1585_v5 = vld [vmem:[%s1912_s2 + $0x70] sm:$0xff]  ;;  %v1584_v9 = vld [vmem:[%s1912_s2 + $0x68] sm:$0xff] }
   0x3   :  { %v1602_v2 = vld [vmem:[%s1912_s2 + $0xb8] sm:$0xff]  ;;  %484 = vmatpush.bf16.msra.mxu1 %v1586_v1  ;;  %v1601_v6 = vld [vmem:[%s1912_s2 + $0xb0] sm:$0xff]  ;;  %v1600_v10 = vld [vmem:[%s1912_s2 + $0xa8] sm:$0xff] }
   0x4   :  { %v1618_v3 = vld [vmem:[%s1912_s2 + $0xf8] sm:$0xff]  ;;  %795 = vmatpush.bf16.msra.mxu2 %v1602_v2  ;;  %v1617_v7 = vld [vmem:[%s1912_s2 + $0xf0] sm:$0xff]  ;;  %v1616_v11 = vld [vmem:[%s1912_s2 + $0xe8] sm:$0xff] }
   0x5   :  { %1043 = vmatpush.bf16.msra.mxu3 %v1618_v3  ;;  %v1567_v12 = vld [vmem:[%s1912_s2 + $0x20] sm:$0xff]  ;;  %v234_v17 = vld [vmem:[%s1913_s0 + $0x8] sm:$0xff]   ;;  %v236_v18 = vld [vmem:[%s1913_s0 + $0x10] sm:$0xff]  }
   0x6   :  { %168 = vmatpush.bf16.msra.mxu0 %v1569_v4  ;;  %v1583_v13 = vld [vmem:[%s1912_s2 + $0x60] sm:$0xff]  ;;  %250 = vst [vmem:[#allocation2 + $0x8] sm:$0xff] %v234_v17   ;;  %v1566_v19 = vld [vmem:[%s1912_s2 + $0x18] sm:$0xff]  ;;  %v1565_v23 = vld [vmem:[%s1912_s2 + $0x10] sm:$0xff] }
   0x7   :  { %485 = vmatpush.bf16.msra.mxu1 %v1585_v5  ;;  %v1599_v14 = vld [vmem:[%s1912_s2 + $0xa0] sm:$0xff]  ;;  %v1582_v20 = vld [vmem:[%s1912_s2 + $0x58] sm:$0xff]  ;;  %252 = vst [vmem:[#allocation2 + $0x10] sm:$0xff] %v236_v18   ;;  %v1581_v25 = vld [vmem:[%s1912_s2 + $0x50] sm:$0xff] }
   0x8   :  { %796 = vmatpush.bf16.msra.mxu2 %v1601_v6  ;;  %v1615_v15 = vld [vmem:[%s1912_s2 + $0xe0] sm:$0xff]  ;;  %v1598_v21 = vld [vmem:[%s1912_s2 + $0x98] sm:$0xff]  ;;  %v1597_v26 = vld [vmem:[%s1912_s2 + $0x90] sm:$0xff] }
   0x9   :  { %1044 = vmatpush.bf16.msra.mxu3 %v1617_v7  ;;  %v232_v16 = vld [vmem:[%s1913_s0] sm:$0xff]   ;;  %v1614_v22 = vld [vmem:[%s1912_s2 + $0xd8] sm:$0xff]  ;;  %v1613_v27 = vld [vmem:[%s1912_s2 + $0xd0] sm:$0xff] }
   0xa   :  { %169 = vmatpush.bf16.msra.mxu0 %v1568_v8  ;;  %248 = vst [vmem:[#allocation2] sm:$0xff] %v232_v16   ;;  %v238_v24 = vld [vmem:[%s1913_s0 + $0x18] sm:$0xff]   ;;  %v1564_v38 = vld [vmem:[%s1912_s2 + $0x8] sm:$0xff]  ;;  %v1563_v54 = vld [vmem:[%s1912_s2] sm:$0xff] }
   0xb   :  { %486 = vmatpush.bf16.msra.mxu1 %v1584_v9  ;;  %254 = vst [vmem:[#allocation2 + $0x18] sm:$0xff] %v238_v24   ;;  %v1580_v39 = vld [vmem:[%s1912_s2 + $0x48] sm:$0xff]  ;;  %v1579_v55 = vld [vmem:[%s1912_s2 + $0x40] sm:$0xff] }
   0xc   :  { %797 = vmatpush.bf16.msra.mxu2 %v1600_v10  ;;  %v1596_v44 = vld [vmem:[%s1912_s2 + $0x88] sm:$0xff]  ;;  %v1595_v58 = vld [vmem:[%s1912_s2 + $0x80] sm:$0xff] }
   0xd   :  { %1045 = vmatpush.bf16.msra.mxu3 %v1616_v11  ;;  %v1776_v31 = vld [vmem:[#allocation2 + $0x8] sm:$0xff]  ;;  %v1611_v59 = vld [vmem:[%s1912_s2 + $0xc0] sm:$0xff] }
   0xe   :  { %170 = vmatpush.bf16.msra.mxu0 %v1567_v12  ;;  %v1588_v32 = vld [vmem:[#allocation2 + $0x8] sm:$0xff]  ;;  %v368_v40 = vshll.u32 %v1776_v31, 16  ;;  %v1555_v0 = vld [vmem:[%s1913_s0] sm:$0xff]  ;;  %v1589_v4 = vld [vmem:[#allocation2 + $0x10] sm:$0xff]  ;;  %v372_v9 = vshrl.u32 %v1776_v31, 16 }
   0xf   :  { %487 = vmatpush.bf16.msra.mxu1 %v1583_v13  ;;  %v668_v43 = vshrl.u32 %v1588_v32, 16  ;;  %v1612_v45 = vld [vmem:[%s1912_s2 + $0xc8] sm:$0xff]  ;;  %v671_v47 = vshll.u32 %v1588_v32, 16  ;;  %v240_v5 = vld [vmem:[%s1913_s0 + $0x20] sm:$0xff]   ;;  %v1573_v6 = vld [vmem:[#allocation2 + $0x10] sm:$0xff]  ;;  %v677_v7 = vshrl.u32 %v1589_v4, 16 }
  0x10   :  { %798 = vmatpush.bf16.msra.mxu2 %v1599_v14  ;;  %v1604_v48 = vld [vmem:[#allocation2 + $0x8] sm:$0xff]  ;;  %v370_v57 = vrot.slane %v368_v40, 1  ;;  %256 = vst [vmem:[#allocation2 + $0x20] sm:$0xff] %v240_v5   ;;  %v680_v8 = vshll.u32 %v1589_v4, 16  ;;  %v376_v10 = vshll.u32 %v1573_v6, 16  ;;  %v1605_v13 = vld [vmem:[#allocation2 + $0x10] sm:$0xff] }
  0x11   :  { %1046 = vmatpush.bf16.msra.mxu3 %v1615_v15  ;;  %v1571_v28 = vld [vmem:[#allocation2] sm:$0xff]  ;;  %v670_v52 = vrot.slane %v668_v43, 2  ;;  %v673_v53 = vrot.slane %v671_v47, 3  ;;  %v971_v63 = vrot.slane %v1604_v48, 3  ;;  %v679_v11 = vrot.slane %v677_v7, 2  ;;  %v1556_v18 = vld [vmem:[%s1913_s0 + $0x8] sm:$0xff] }
  0x12   :  { %171 = vmatpush.bf16.msra.mxu0 %v1566_v19  ;;  %v1413_v29 = vld [vmem:[#allocation2] sm:$0xc]  ;;  %v1587_v30 = vld [vmem:[#allocation2] sm:$0xf0]  ;;  %v361_v35 = vshrl.u32 %v1571_v28, 16  ;;  %v363_v36 = vshll.u32 %v1571_v28, 16  ;;  %v374_v14 = vor.u32 %v372_v9, %v370_v57 }
  0x13   :  { %488 = vmatpush.bf16.msra.mxu1 %v1582_v20  ;;  %v1414_v33 = vor.u32 %v1587_v30, %v1413_v29  ;;  %v1493_v34 = vld [vmem:[#allocation2] sm:$0x8]  ;;  %v1603_v37 = vld [vmem:[#allocation2] sm:$0xf0]  ;;  %v674_v61 = vor.u32 %v673_v53, %v670_v52  ;;  %v682_v12 = vrot.slane %v680_v8, 3  ;;  %v378_v15 = vrot.slane %v376_v10, 1 }
  0x14   :  { %799 = vmatpush.bf16.msra.mxu2 %v1598_v21  ;;  %v365_v46 = vrot.slane %v363_v36, 1  ;;  %v1494_v49 = vor.u32 %v1603_v37, %v1493_v34  ;;  %v973_v17 = vrot.slane %v1605_v13, 3  ;;  %v1574_v24 = vld [vmem:[#allocation2 + $0x18] sm:$0xff]  ;;  %v1557_v36 = vld [vmem:[%s1913_s0 + $0x10] sm:$0xff]  ;;  %v1559_v8 = vld [vmem:[%s1913_s0 + $0x20] sm:$0xff] }
  0x15   :  { %1047 = vmatpush.bf16.msra.mxu3 %v1614_v22  ;;  %v660_v41 = vshrl.u32 %v1414_v33, 16  ;;  %v663_v42 = vshll.u32 %v1414_v33, 16  ;;  %v683_v16 = vor.u32 %v682_v12, %v679_v11  ;;  %v379_v19 = vsel %vm359_vm0, %v374_v14, %v378_v15  ;;  %v1590_v22 = vld [vmem:[#allocation2 + $0x18] sm:$0xff]  ;;  %v1314_v10 = vld [vmem:[%s1915_s1 + $0x40] sm:$0xf] }
  0x16   :  { %172 = vmatpush.bf16.msra.mxu0 %v1565_v23  ;;  %v366_v56 = vor.u32 %v365_v46, %v361_v35  ;;  %v970_v62 = vrot.slane %v1494_v49, 3  ;;  %v974_v21 = vsel %vm969_vm2, %v971_v63, %v973_v17  ;;  %v242_v23 = vld [vmem:[%s1913_s0 + $0x28] sm:$0xff]   ;;  %v384_v28 = vshll.u32 %v1574_v24, 16  ;;  %v1606_v31 = vld [vmem:[#allocation2 + $0x18] sm:$0xff]  ;;  %265 = vst [vmem:[#allocation2 + $0x40] sm:$0xf] %v1314_v10 }
  0x17   :  { %489 = vmatpush.bf16.msra.mxu1 %v1581_v25  ;;  %v662_v50 = vrot.slane %v660_v41, 2  ;;  %v665_v51 = vrot.slane %v663_v42, 3  ;;  %v684_v20 = vsel %vm658_vm1, %v674_v61, %v683_v16  ;;  %258 = vst [vmem:[#allocation2 + $0x28] sm:$0xff] %v242_v23   ;;  %v686_v25 = vshrl.u32 %v1590_v22, 16  ;;  %v1591_v40 = vld [vmem:[#allocation2 + $0x20] sm:$0xff]  ;;  %v244_v41 = vld [vmem:[%s1913_s0 + $0x30] sm:$0xff]  }
  0x18   :  { %800 = vmatpush.bf16.msra.mxu2 %v1597_v26  ;;  %v371_v1 = vsel %vm359_vm0, %v366_v56, %v370_v57  ;;  %v972_v3 = vsel %vm969_vm2, %v970_v62, %v971_v63  ;;  %v689_v26 = vshll.u32 %v1590_v22, 16  ;;  %v386_v33 = vrot.slane %v384_v28, 1  ;;  %v1575_v42 = vld [vmem:[#allocation2 + $0x20] sm:$0xff]  ;;  %260 = vst [vmem:[#allocation2 + $0x30] sm:$0xff] %v244_v41  }
  0x19   :  { %1048 = vmatpush.bf16.msra.mxu3 %v1613_v27  ;;  %v666_v60 = vor.u32 %v665_v51, %v662_v50  ;;  %v380_v27 = vshrl.u32 %v1573_v6, 16  ;;  %v688_v29 = vrot.slane %v686_v25, 2  ;;  %v975_v35 = vrot.slane %v1606_v31, 3  ;;  %v1607_v49 = vld [vmem:[#allocation2 + $0x20] sm:$0xff] }
  0x1a   :  { %173 = vmatpush.bf16.msra.mxu0 %v1564_v38  ;;  %v691_v30 = vrot.slane %v689_v26, 3  ;;  %v695_v43 = vshrl.u32 %v1591_v40, 16  ;;  %v392_v46 = vshll.u32 %v1575_v42, 16  ;;  %v977_v53 = vrot.slane %v1607_v49, 3  ;;  %v1560_v26 = vld [vmem:[%s1913_s0 + $0x28] sm:$0xff] }
  0x1b   :  { %490 = vmatpush.bf16.msra.mxu1 %v1580_v39  ;;  %v675_v2 = vsel %vm658_vm1, %v666_v60, %v674_v61  ;;  %v382_v32 = vor.u32 %v380_v27, %v378_v15  ;;  %v976_v39 = vsel %vm969_vm2, %v973_v17, %v975_v35  ;;  %v396_v63 = vshrl.u32 %v1575_v42, 16 }
  0x1c   :  { %801 = vmatpush.bf16.msra.mxu2 %v1596_v44  ;;  %v692_v34 = vor.u32 %v691_v30, %v688_v29  ;;  %v698_v44 = vshll.u32 %v1591_v40, 16  ;;  %v697_v47 = vrot.slane %v695_v43, 2  ;;  %v394_v51 = vrot.slane %v392_v46, 1  ;;  %v1561_v46 = vld [vmem:[%s1913_s0 + $0x30] sm:$0xff] }
  0x1d   :  { %1049 = vmatpush.bf16.msra.mxu3 %v1612_v45  ;;  %v387_v37 = vsel %vm359_vm0, %v382_v32, %v386_v33  ;;  %v388_v45 = vshrl.u32 %v1574_v24, 16  ;;  %v978_v57 = vsel %vm969_vm2, %v975_v35, %v977_v53 }
  0x1e   :  { %174 = vmatpush.bf16.msra.mxu0 %v1563_v54  ;;  %v693_v38 = vsel %vm658_vm1, %v683_v16, %v692_v34  ;;  %v700_v48 = vrot.slane %v698_v44, 3  ;;  %v1558_v54 = vld [vmem:[%s1913_s0 + $0x18] sm:$0xff]  ;;  %v1576_v60 = vld [vmem:[#allocation2 + $0x28] sm:$0xff]  ;;  %v398_v4 = vor.u32 %v396_v63, %v394_v51  ;;  %v298_v44 = vld [vmem:[#allocation2 + $0x40] sm:$0x1] }
  0x1f   :  { %491 = vmatpush.bf16.msra.mxu1 %v1579_v55  ;;  %v390_v50 = vor.u32 %v388_v45, %v386_v33  ;;  %v1593_v13 = vld [vmem:[#allocation2 + $0x30] sm:$0xff]  ;;  %v404_v17 = vshrl.u32 %v1576_v60, 16 }
  0x20   :  { %802 = vmatpush.bf16.msra.mxu2 %v1595_v58  ;;  %v701_v52 = vor.u32 %v700_v48, %v697_v47  ;;  %v1592_v58 = vld [vmem:[#allocation2 + $0x28] sm:$0xff]  ;;  %v1577_v14 = vld [vmem:[#allocation2 + $0x30] sm:$0xff]  ;;  %v713_v15 = vshrl.u32 %v1593_v13, 16  ;;  %v716_v16 = vshll.u32 %v1593_v13, 16  ;;  %v349_v48 = vunpack.c.l.b16 %v298_v44 }
  0x21   :  { %1050 = vmatpush.bf16.msra.mxu3 %v1611_v59  ;;  %175 = vmatmul.bf16.vlgmr.msra.gmra.mxu0 %v1555_v0  ;;  %v395_v55 = vsel %vm359_vm0, %v390_v50, %v394_v51  ;;  %v246_v59 = vld [vmem:[%s1913_s0 + $0x38] sm:$0xff]   ;;  %v704_v61 = vshrl.u32 %v1592_v58, 16  ;;  %v707_v62 = vshll.u32 %v1592_v58, 16  ;;  %v400_v0 = vshll.u32 %v1576_v60, 16 }
  0x22   :  { %492 = vmatmul.bf16.vlgmr.msra.gmra.mxu1 %v371_v1  ;;  %v702_v56 = vsel %vm658_vm1, %v692_v34, %v701_v52  ;;  %262 = vst [vmem:[#allocation2 + $0x38] sm:$0xff] %v246_v59   ;;  %v412_v34 = vshrl.u32 %v1577_v14, 16 }
  0x23   :  { %803 = vmatmul.bf16.vlgmr.msra.gmra.mxu2 %v675_v2  ;;  %v706_v1 = vrot.slane %v704_v61, 2  ;;  %v709_v2 = vrot.slane %v707_v62, 3  ;;  %v402_v5 = vrot.slane %v400_v0, 1 }
  0x24   :  { %1051 = vmatmul.bf16.vlgmr.msra.gmra.mxu3 %v972_v3  ;;  %v1608_v3 = vld [vmem:[#allocation2 + $0x28] sm:$0xff] }
  0x25   :  { %v710_v6 = vor.u32 %v709_v2, %v706_v1  ;;  %v979_v7 = vrot.slane %v1608_v3, 3  ;;  %v403_v9 = vsel %vm359_vm0, %v398_v4, %v402_v5  ;;  %v406_v22 = vor.u32 %v404_v17, %v402_v5  ;;  %v1562_v2 = vld [vmem:[%s1913_s0 + $0x38] sm:$0xff] }
  0x27   :  { %v711_v11 = vsel %vm658_vm1, %v701_v52, %v710_v6  ;;  %v980_v12 = vsel %vm969_vm2, %v977_v53, %v979_v7  ;;  %v908_v52 = vld [vmem:[#allocation2 + $0x40] sm:$0x7]  ;;  %v358_v53 = vpack.c.b16 %v349_v48, %v349_v48 }
  0x29   :  { %v1594_v30 = vld [vmem:[#allocation2 + $0x38] sm:$0xff]  ;;  %v424_v58 = vshll.u32 %v358_v53, 16 }
  0x2a   :  { %v1578_v31 = vld [vmem:[#allocation2 + $0x38] sm:$0xff]  ;;  %v722_v32 = vshrl.u32 %v1594_v30, 16  ;;  %v725_v33 = vshll.u32 %v1594_v30, 16 }
  0x2b   :  { %v416_v35 = vshll.u32 %v1578_v31, 16  ;;  %v426_v63 = vrot.slane %v424_v58, 1 }
  0x2d   :  { %v418_v41 = vrot.slane %v416_v35, 1 }
  0x31   :  { %180 = vmatmul.bf16.gmra.mxu0 %v1556_v18  ;;  %v408_v18 = vshll.u32 %v1577_v14, 16 }
  0x32   :  { %497 = vmatmul.bf16.gmra.mxu1 %v379_v19  ;;  %v715_v19 = vrot.slane %v713_v15, 2  ;;  %v1870_v15 = vld [vmem:[%s1914_s3] ss:$0 sm:$0xff] }
  0x33   :  { %808 = vmatmul.bf16.gmra.mxu2 %v684_v20  ;;  %v718_v20 = vrot.slane %v716_v16, 3  ;;  %v410_v23 = vrot.slane %v408_v18, 1 }
  0x34   :  { %1056 = vmatmul.bf16.gmra.mxu3 %v974_v21  ;;  %v1609_v21 = vld [vmem:[#allocation2 + $0x30] sm:$0xff] }
  0x35   :  { %v719_v24 = vor.u32 %v718_v20, %v715_v19  ;;  %v981_v25 = vrot.slane %v1609_v21, 3  ;;  %v411_v27 = vsel %vm359_vm0, %v406_v22, %v410_v23  ;;  %v414_v40 = vor.u32 %v412_v34, %v410_v23 }
  0x37   :  { %v720_v28 = vsel %vm658_vm1, %v710_v6, %v719_v24  ;;  %v982_v29 = vsel %vm969_vm2, %v979_v7, %v981_v25  ;;  %v419_v47 = vsel %vm359_vm0, %v414_v40, %v418_v41 }
  0x41   :  { %185 = vmatmul.bf16.gmra.mxu0 %v1557_v36  ;;  %v724_v36 = vrot.slane %v722_v32, 2 }
  0x42   :  { %502 = vmatmul.bf16.gmra.mxu1 %v387_v37  ;;  %v727_v37 = vrot.slane %v725_v33, 3 }
  0x43   :  { %813 = vmatmul.bf16.gmra.mxu2 %v693_v38  ;;  %v1610_v38 = vld [vmem:[#allocation2 + $0x38] sm:$0xff] }
  0x44   :  { %1061 = vmatmul.bf16.gmra.mxu3 %v976_v39  ;;  %v597_v39 = vld [vmem:[#allocation2 + $0x40] sm:$0x7]  ;;  %v728_v42 = vor.u32 %v727_v37, %v724_v36  ;;  %v983_v43 = vrot.slane %v1610_v38, 3 }
  0x45   :  { %v648_v45 = vunpack.c.l.b16 %v597_v39 }
  0x46   :  { %v729_v49 = vsel %vm658_vm1, %v719_v24, %v728_v42  ;;  %v984_v50 = vsel %vm969_vm2, %v981_v25, %v983_v43 }
  0x47   :  { %v657_v51 = vpack.c.b16 %v648_v45, %v648_v45 }
  0x51   :  { %190 = vmatmul.bf16.gmra.mxu0 %v1558_v54  ;;  %v731_v54 = vshrl.u32 %v657_v51, 16 }
  0x52   :  { %507 = vmatmul.bf16.gmra.mxu1 %v395_v55  ;;  %v734_v55 = vshll.u32 %v657_v51, 16 }
  0x53   :  { %818 = vmatmul.bf16.gmra.mxu2 %v702_v56  ;;  %v959_v56 = vunpack.c.l.b16 %v908_v52  ;;  %v733_v59 = vrot.slane %v731_v54, 2 }
  0x54   :  { %1066 = vmatmul.bf16.gmra.mxu3 %v978_v57  ;;  %v420_v57 = vshrl.u32 %v1578_v31, 16  ;;  %v736_v60 = vrot.slane %v734_v55, 3 }
  0x55   :  { %v968_v61 = vpack.c.b16 %v959_v56, %v959_v56 }
  0x56   :  { %v422_v62 = vor.u32 %v420_v57, %v418_v41  ;;  %v737_v0 = vor.u32 %v736_v60, %v733_v59 }
  0x57   :  { %v985_v1 = vrot.slane %v968_v61, 3 }
  0x58   :  { %v427_v3 = vsel %vm359_vm0, %v422_v62, %v426_v63  ;;  %v738_v4 = vsel %vm658_vm1, %v728_v42, %v737_v0 }
  0x59   :  { %v986_v5 = vsel %vm969_vm2, %v983_v43, %v985_v1 }
  0x61   :  { %195 = vmatmul.bf16.gmra.mxu0 %v1559_v8 }
  0x62   :  { %512 = vmatmul.bf16.gmra.mxu1 %v403_v9 }
  0x63   :  { %823 = vmatmul.bf16.gmra.mxu2 %v711_v11 }
  0x64   :  { %1071 = vmatmul.bf16.gmra.mxu3 %v980_v12 }
  0x71   :  { %200 = vmatmul.bf16.gmra.mxu0 %v1560_v26 }
  0x72   :  { %517 = vmatmul.bf16.gmra.mxu1 %v411_v27 }
  0x73   :  { %828 = vmatmul.bf16.gmra.mxu2 %v720_v28 }
  0x74   :  { %1076 = vmatmul.bf16.gmra.mxu3 %v982_v29 }
  0x81   :  { %205 = vmatmul.bf16.gmra.mxu0 %v1561_v46 }
  0x82   :  { %522 = vmatmul.bf16.gmra.mxu1 %v419_v47 }
  0x83   :  { %833 = vmatmul.bf16.gmra.mxu2 %v729_v49 }
  0x84   :  { %1081 = vmatmul.bf16.gmra.mxu3 %v984_v50 }
  0x91   :  { %210 = vmatmul.bf16.gmra.mxu0 %v1562_v2 }
  0x92   :  { %527 = vmatmul.bf16.gmra.mxu1 %v427_v3 }
  0x93   :  { %838 = vmatmul.bf16.gmra.mxu2 %v738_v4 }
  0x94   :  { %1086 = vmatmul.bf16.gmra.mxu3 %v986_v5 }
  0x9e   :  { %v176_v6 = vpop.f32.mrf.mxu0 }
  0x9f   :  { %v493_v7 = vpop.f32.mrf.mxu1 }
  0xa0   :  { %v533_v8 = vadd.f32 %v493_v7, %v176_v6 }
  0xa6   :  { %v804_v9 = vpop.f32.mrf.mxu2  ;;  %v178_v12 = vpop.f32.mrf.mxu0 }
  0xa7   :  { %v1052_v10 = vpop.f32.mrf.mxu3  ;;  %v844_v11 = vadd.f32 %v804_v9, %v533_v8  ;;  %v495_v13 = vpop.f32.mrf.mxu1 }
  0xa8   :  { %v534_v16 = vadd.f32 %v495_v13, %v178_v12 }
  0xa9   :  { %v1092_v14 = vadd.f32 %v1052_v10, %v844_v11 }
  0xab   :  { %v1144_v19 = vadd.f32 %v1870_v15, %v1092_v14 }
  0xad   :  { %v1176_v24 = vmul.f32 0.01, %v1144_v19  ;;  %vm1160_vm3 = vcmp.ge.f32.partialorder %v1144_v19, 0.0 }
  0xae   :  { %v806_v17 = vpop.f32.mrf.mxu2  ;;  %v181_v21 = vpop.f32.mrf.mxu0 }
  0xaf   :  { %v1054_v18 = vpop.f32.mrf.mxu3  ;;  %v845_v20 = vadd.f32 %v806_v17, %v534_v16  ;;  %v498_v22 = vpop.f32.mrf.mxu1  ;;  %v1192_v30 = vsel %vm1160_vm3, %v1144_v19, %v1176_v24 }
  0xb0   :  { %v535_v26 = vadd.f32 %v498_v22, %v181_v21 }
  0xb1   :  { %v1093_v23 = vadd.f32 %v1054_v18, %v845_v20 }
  0xb3   :  { %v1145_v25 = vadd.f32 %v1870_v15, %v1093_v23 }
  0xb5   :  { %vm1161_vm4 = vcmp.ge.f32.partialorder %v1145_v25, 0.0  ;;  %v1177_v27 = vmul.f32 0.01, %v1145_v25 }
  0xb6   :  { %v809_v28 = vpop.f32.mrf.mxu2  ;;  %v183_v33 = vpop.f32.mrf.mxu0 }
  0xb7   :  { %v1057_v29 = vpop.f32.mrf.mxu3  ;;  %v1193_v31 = vsel %vm1161_vm4, %v1145_v25, %v1177_v27  ;;  %v846_v32 = vadd.f32 %v809_v28, %v535_v26  ;;  %v500_v34 = vpop.f32.mrf.mxu1 }
  0xb8   :  { %v1622_v35 = vpack.c.bf16 %v1193_v31, %v1192_v30  ;;  %v536_v37 = vadd.f32 %v500_v34, %v183_v33 }
  0xb9   :  { %v1094_v36 = vadd.f32 %v1057_v29, %v846_v32 }
  0xba   :  { %1623 = vst [vmem:[%s1916_s4] sm:$0xff] %v1622_v35  }
  0xbb   :  { %v1146_v40 = vadd.f32 %v1870_v15, %v1094_v36 }
  0xbd   :  { %v1178_v45 = vmul.f32 0.01, %v1146_v40  ;;  %vm1162_vm5 = vcmp.ge.f32.partialorder %v1146_v40, 0.0 }
  0xbe   :  { %v811_v38 = vpop.f32.mrf.mxu2  ;;  %v186_v42 = vpop.f32.mrf.mxu0 }
  0xbf   :  { %v1059_v39 = vpop.f32.mrf.mxu3  ;;  %v847_v41 = vadd.f32 %v811_v38, %v536_v37  ;;  %v503_v43 = vpop.f32.mrf.mxu1  ;;  %v1194_v51 = vsel %vm1162_vm5, %v1146_v40, %v1178_v45 }
  0xc0   :  { %v537_v47 = vadd.f32 %v503_v43, %v186_v42 }
  0xc1   :  { %v1095_v44 = vadd.f32 %v1059_v39, %v847_v41 }
  0xc3   :  { %v1147_v46 = vadd.f32 %v1870_v15, %v1095_v44 }
  0xc5   :  { %vm1163_vm6 = vcmp.ge.f32.partialorder %v1147_v46, 0.0  ;;  %v1179_v48 = vmul.f32 0.01, %v1147_v46 }
  0xc6   :  { %v814_v49 = vpop.f32.mrf.mxu2  ;;  %v188_v54 = vpop.f32.mrf.mxu0 }
  0xc7   :  { %v1062_v50 = vpop.f32.mrf.mxu3  ;;  %v1195_v52 = vsel %vm1163_vm6, %v1147_v46, %v1179_v48  ;;  %v848_v53 = vadd.f32 %v814_v49, %v537_v47  ;;  %v505_v55 = vpop.f32.mrf.mxu1 }
  0xc8   :  { %v1627_v56 = vpack.c.bf16 %v1195_v52, %v1194_v51  ;;  %v538_v58 = vadd.f32 %v505_v55, %v188_v54 }
  0xc9   :  { %v1096_v57 = vadd.f32 %v1062_v50, %v848_v53 }
  0xca   :  { %1659 = vst [vmem:[%s1916_s4 + $0x8] sm:$0xff] %v1627_v56  }
  0xcb   :  { %v1148_v61 = vadd.f32 %v1870_v15, %v1096_v57 }
  0xcd   :  { %v1180_v2 = vmul.f32 0.01, %v1148_v61  ;;  %vm1164_vm7 = vcmp.ge.f32.partialorder %v1148_v61, 0.0 }
  0xce   :  { %v816_v59 = vpop.f32.mrf.mxu2  ;;  %v191_v63 = vpop.f32.mrf.mxu0 }
  0xcf   :  { %v1064_v60 = vpop.f32.mrf.mxu3  ;;  %v849_v62 = vadd.f32 %v816_v59, %v538_v58  ;;  %v508_v0 = vpop.f32.mrf.mxu1  ;;  %v1196_v8 = vsel %vm1164_vm7, %v1148_v61, %v1180_v2 }
  0xd0   :  { %v539_v4 = vadd.f32 %v508_v0, %v191_v63 }
  0xd1   :  { %v1097_v1 = vadd.f32 %v1064_v60, %v849_v62 }
  0xd3   :  { %v1149_v3 = vadd.f32 %v1870_v15, %v1097_v1 }
  0xd5   :  { %vm1165_vm8 = vcmp.ge.f32.partialorder %v1149_v3, 0.0  ;;  %v1181_v5 = vmul.f32 0.01, %v1149_v3 }
  0xd6   :  { %v819_v6 = vpop.f32.mrf.mxu2  ;;  %v193_v11 = vpop.f32.mrf.mxu0 }
  0xd7   :  { %v1067_v7 = vpop.f32.mrf.mxu3  ;;  %v1197_v9 = vsel %vm1165_vm8, %v1149_v3, %v1181_v5  ;;  %v850_v10 = vadd.f32 %v819_v6, %v539_v4  ;;  %v510_v12 = vpop.f32.mrf.mxu1 }
  0xd8   :  { %v1632_v13 = vpack.c.bf16 %v1197_v9, %v1196_v8  ;;  %v540_v16 = vadd.f32 %v510_v12, %v193_v11 }
  0xd9   :  { %v1098_v14 = vadd.f32 %v1067_v7, %v850_v10 }
  0xda   :  { %1660 = vst [vmem:[%s1916_s4 + $0x10] sm:$0xff] %v1632_v13  }
  0xdb   :  { %v1150_v19 = vadd.f32 %v1870_v15, %v1098_v14 }
  0xdd   :  { %v1182_v24 = vmul.f32 0.01, %v1150_v19  ;;  %vm1166_vm9 = vcmp.ge.f32.partialorder %v1150_v19, 0.0 }
  0xde   :  { %v821_v17 = vpop.f32.mrf.mxu2  ;;  %v196_v21 = vpop.f32.mrf.mxu0 }
  0xdf   :  { %v1069_v18 = vpop.f32.mrf.mxu3  ;;  %v851_v20 = vadd.f32 %v821_v17, %v540_v16  ;;  %v513_v22 = vpop.f32.mrf.mxu1  ;;  %v1198_v30 = vsel %vm1166_vm9, %v1150_v19, %v1182_v24 }
  0xe0   :  { %v541_v26 = vadd.f32 %v513_v22, %v196_v21 }
  0xe1   :  { %v1099_v23 = vadd.f32 %v1069_v18, %v851_v20 }
  0xe3   :  { %v1151_v25 = vadd.f32 %v1870_v15, %v1099_v23 }
  0xe5   :  { %vm1167_vm10 = vcmp.ge.f32.partialorder %v1151_v25, 0.0  ;;  %v1183_v27 = vmul.f32 0.01, %v1151_v25 }
  0xe6   :  { %v824_v28 = vpop.f32.mrf.mxu2  ;;  %v198_v33 = vpop.f32.mrf.mxu0 }
  0xe7   :  { %v1072_v29 = vpop.f32.mrf.mxu3  ;;  %v1199_v31 = vsel %vm1167_vm10, %v1151_v25, %v1183_v27  ;;  %v852_v32 = vadd.f32 %v824_v28, %v541_v26  ;;  %v515_v34 = vpop.f32.mrf.mxu1 }
  0xe8   :  { %v1637_v35 = vpack.c.bf16 %v1199_v31, %v1198_v30  ;;  %v542_v37 = vadd.f32 %v515_v34, %v198_v33 }
  0xe9   :  { %v1100_v36 = vadd.f32 %v1072_v29, %v852_v32 }
  0xea   :  { %1661 = vst [vmem:[%s1916_s4 + $0x18] sm:$0xff] %v1637_v35  }
  0xeb   :  { %v1152_v40 = vadd.f32 %v1870_v15, %v1100_v36 }
  0xed   :  { %v1184_v45 = vmul.f32 0.01, %v1152_v40  ;;  %vm1168_vm11 = vcmp.ge.f32.partialorder %v1152_v40, 0.0 }
  0xee   :  { %v826_v38 = vpop.f32.mrf.mxu2  ;;  %v201_v42 = vpop.f32.mrf.mxu0 }
  0xef   :  { %v1074_v39 = vpop.f32.mrf.mxu3  ;;  %v853_v41 = vadd.f32 %v826_v38, %v542_v37  ;;  %v518_v43 = vpop.f32.mrf.mxu1  ;;  %v1200_v51 = vsel %vm1168_vm11, %v1152_v40, %v1184_v45 }
  0xf0   :  { %v543_v47 = vadd.f32 %v518_v43, %v201_v42 }
  0xf1   :  { %v1101_v44 = vadd.f32 %v1074_v39, %v853_v41 }
  0xf3   :  { %v1153_v46 = vadd.f32 %v1870_v15, %v1101_v44 }
  0xf5   :  { %vm1169_vm12 = vcmp.ge.f32.partialorder %v1153_v46, 0.0  ;;  %v1185_v48 = vmul.f32 0.01, %v1153_v46 }
  0xf6   :  { %v829_v49 = vpop.f32.mrf.mxu2  ;;  %v203_v54 = vpop.f32.mrf.mxu0 }
  0xf7   :  { %v1077_v50 = vpop.f32.mrf.mxu3  ;;  %v1201_v52 = vsel %vm1169_vm12, %v1153_v46, %v1185_v48  ;;  %v854_v53 = vadd.f32 %v829_v49, %v543_v47  ;;  %v520_v55 = vpop.f32.mrf.mxu1 }
  0xf8   :  { %v1642_v56 = vpack.c.bf16 %v1201_v52, %v1200_v51  ;;  %v544_v58 = vadd.f32 %v520_v55, %v203_v54 }
  0xf9   :  { %v1102_v57 = vadd.f32 %v1077_v50, %v854_v53 }
  0xfa   :  { %1662 = vst [vmem:[%s1916_s4 + $0x20] sm:$0xff] %v1642_v56  }
  0xfb   :  { %v1154_v61 = vadd.f32 %v1870_v15, %v1102_v57 }
  0xfd   :  { %v1186_v2 = vmul.f32 0.01, %v1154_v61  ;;  %vm1170_vm13 = vcmp.ge.f32.partialorder %v1154_v61, 0.0 }
  0xfe   :  { %v831_v59 = vpop.f32.mrf.mxu2  ;;  %v206_v63 = vpop.f32.mrf.mxu0 }
  0xff   :  { %v1079_v60 = vpop.f32.mrf.mxu3  ;;  %v855_v62 = vadd.f32 %v831_v59, %v544_v58  ;;  %v523_v0 = vpop.f32.mrf.mxu1  ;;  %v1202_v8 = vsel %vm1170_vm13, %v1154_v61, %v1186_v2 }
 0x100   :  { %v545_v4 = vadd.f32 %v523_v0, %v206_v63 }
 0x101   :  { %v1103_v1 = vadd.f32 %v1079_v60, %v855_v62 }
 0x103   :  { %v1155_v3 = vadd.f32 %v1870_v15, %v1103_v1 }
 0x105   :  { %vm1171_vm14 = vcmp.ge.f32.partialorder %v1155_v3, 0.0  ;;  %v1187_v5 = vmul.f32 0.01, %v1155_v3 }
 0x106   :  { %v834_v6 = vpop.f32.mrf.mxu2  ;;  %v208_v11 = vpop.f32.mrf.mxu0 }
 0x107   :  { %v1082_v7 = vpop.f32.mrf.mxu3  ;;  %v1203_v9 = vsel %vm1171_vm14, %v1155_v3, %v1187_v5  ;;  %v856_v10 = vadd.f32 %v834_v6, %v545_v4  ;;  %v525_v12 = vpop.f32.mrf.mxu1 }
 0x108   :  { %v1647_v13 = vpack.c.bf16 %v1203_v9, %v1202_v8  ;;  %v546_v16 = vadd.f32 %v525_v12, %v208_v11 }
 0x109   :  { %v1104_v14 = vadd.f32 %v1082_v7, %v856_v10 }
 0x10a   :  { %1663 = vst [vmem:[%s1916_s4 + $0x28] sm:$0xff] %v1647_v13  }
 0x10b   :  { %v1156_v19 = vadd.f32 %v1870_v15, %v1104_v14 }
 0x10d   :  { %v1188_v24 = vmul.f32 0.01, %v1156_v19  ;;  %vm1172_vm15 = vcmp.ge.f32.partialorder %v1156_v19, 0.0 }
 0x10e   :  { %v836_v17 = vpop.f32.mrf.mxu2  ;;  %v211_v21 = vpop.f32.mrf.mxu0 }
 0x10f   :  { %v1084_v18 = vpop.f32.mrf.mxu3  ;;  %v857_v20 = vadd.f32 %v836_v17, %v546_v16  ;;  %v528_v22 = vpop.f32.mrf.mxu1  ;;  %v1204_v30 = vsel %vm1172_vm15, %v1156_v19, %v1188_v24 }
 0x110   :  { %v547_v26 = vadd.f32 %v528_v22, %v211_v21 }
 0x111   :  { %v1105_v23 = vadd.f32 %v1084_v18, %v857_v20 }
 0x113   :  { %v1157_v25 = vadd.f32 %v1870_v15, %v1105_v23 }
 0x115   :  { %vm1173_vm0 = vcmp.ge.f32.partialorder %v1157_v25, 0.0  ;;  %v1189_v27 = vmul.f32 0.01, %v1157_v25 }
 0x116   :  { %v839_v28 = vpop.f32.mrf.mxu2  ;;  %v213_v34 = vpop.f32.mrf.mxu0 }
 0x117   :  { %v1087_v29 = vpop.f32.mrf.mxu3  ;;  %v1205_v31 = vsel %vm1173_vm0, %v1157_v25, %v1189_v27  ;;  %v858_v32 = vadd.f32 %v839_v28, %v547_v26  ;;  %v530_v35 = vpop.f32.mrf.mxu1 }
 0x118   :  { %v1652_v33 = vpack.c.bf16 %v1205_v31, %v1204_v30  ;;  %v548_v37 = vadd.f32 %v530_v35, %v213_v34 }
 0x119   :  { %v1106_v36 = vadd.f32 %v1087_v29, %v858_v32 }
 0x11a   :  { %1664 = vst [vmem:[%s1916_s4 + $0x30] sm:$0xff] %v1652_v33  }
 0x11b   :  { %v1158_v39 = vadd.f32 %v1870_v15, %v1106_v36 }
 0x11d   :  { %v1190_v43 = vmul.f32 0.01, %v1158_v39  ;;  %vm1174_vm1 = vcmp.ge.f32.partialorder %v1158_v39, 0.0 }
 0x11e   :  { %v841_v38 = vpop.f32.mrf.mxu2 }
 0x11f   :  { %v859_v40 = vadd.f32 %v841_v38, %v548_v37  ;;  %v1089_v41 = vpop.f32.mrf.mxu3  ;;  %v1206_v46 = vsel %vm1174_vm1, %v1158_v39, %v1190_v43 }
 0x121   :  { %v1107_v42 = vadd.f32 %v1089_v41, %v859_v40 }
 0x123   :  { %v1159_v44 = vadd.f32 %v1870_v15, %v1107_v42 }
 0x125   :  { %vm1175_vm2 = vcmp.ge.f32.partialorder %v1159_v44, 0.0  ;;  %v1191_v45 = vmul.f32 0.01, %v1159_v44 }
 0x127   :  { %v1207_v47 = vsel %vm1175_vm2, %v1159_v44, %v1191_v45 }
 0x128   :  { %v1657_v48 = vpack.c.bf16 %v1207_v47, %v1206_v46 }
 0x12a   :  { %1665 = vst [vmem:[%s1916_s4 + $0x38] sm:$0xff] %v1657_v48  }

</bundles_post_ra>
